<compile_context>
chip_gen: v7x
topology: tpu7x:2x2x1
jax: 0.10.0
libtpu: 0.0.40
codegen_flags: <defaults>
</compile_context>

<pallas_src>
import functools

import jax
import jax.numpy as jnp
from jax.experimental import pallas as pl
from jax.experimental.pallas import tpu as pltpu


def _lambda_conv1d_kernel(x_ref, w_ref, emb_ref, out_ref, vwin_ref, *,
                          nhead, dim_k, dim_u, dim_v, dim_m, padding):
    H, K, U, V, M = nhead, dim_k, dim_u, dim_v, dim_m
    BT, CP, N = x_ref.shape
    HK, KU = H * K, K * U
    VN = V * N

    # lane position (n within each length-N segment of the merged (v, n) lane
    # axis), used for the local-context edge masks; hoisted out of all loops.
    lane = jax.lax.broadcasted_iota(jnp.int32, (U, VN), 1)
    if (N & (N - 1)) == 0:
        n_local = lane & (N - 1)
    else:
        n_local = lane % N

    for b in range(BT):                 # static unroll over the small batch block
        # --- fused 1x1 convs (+ folded BN scale/shift and biases): one MXU matmul
        qkv = jnp.dot(w_ref[...], x_ref[b],
                      preferred_element_type=jnp.float32)          # (HK+KU+VU, N)
        q = qkv[:HK, :]                                            # (H*K, N)
        k = qkv[HK:HK + KU, :]                                     # (K*U, N)
        v = qkv[HK + KU:, :]                                       # (V*U, N)

        # --- softmax over the sequence (lane) axis for every (k, u) row
        k = k - jnp.max(k, axis=-1, keepdims=True)
        k = jnp.exp(k)
        k = k * pl.reciprocal(jnp.sum(k, axis=-1, keepdims=True), approx=True)

        # --- content lambda: ONE 512-deep MXU contraction over (u, n)
        k2d = k.reshape(K, U * N)       # row kk = keys[kk, u, :] concatenated over u
        v2d = v.reshape(V, U * N)       # row v  = values[v, u, :] concatenated over u
        lambda_cT = jax.lax.dot_general(                            # (V, K)
            v2d, k2d, (((1,), (1,)), ((), ())),
            preferred_element_type=jnp.float32)

        # --- positional lambda: im2col (rolls + edge masks into VMEM scratch)
        #     followed by ONE (K, U*M) @ (U*M, V*N) MXU matmul.
        vb = v.reshape(U, VN)           # values.view(bs, U, V, N), (v, n) merged into lanes
        for m in range(M):
            s = m - padding             # window offset in [-pad, pad]
            if s == 0:
                part = vb
            else:
                # out[.., n] = vb[.., n + s], zero outside [0, N) in each segment
                shifted = pltpu.roll(vb, (-s) % VN, axis=1)
                valid = jnp.logical_and(n_local + s >= 0, n_local + s < N)
                part = jnp.where(valid, shifted, 0.0)
            vwin_ref[m * U:(m + 1) * U, :] = part
        lambda_p = jnp.dot(emb_ref[...], vwin_ref[...],
                           preferred_element_type=jnp.float32)      # (K, V*N)

        # --- per-head outputs: y_c on the MXU; y_p is a per-lane contraction
        #     over K (lambda_p varies with n, so it is not a matmul).
        for h in range(H):
            q_h = q[h * K:(h + 1) * K, :]                           # (K, N)
            y_c = jnp.dot(lambda_cT, q_h,
                          preferred_element_type=jnp.float32)       # (V, N)
            q_t = jnp.concatenate([q_h] * V, axis=1)                # (K, V*N), lane-aligned tile
            y_p = jnp.sum(q_t * lambda_p, axis=0,
                          keepdims=True).reshape(V, N)              # (V, N)
            out_ref[b, h * V:(h + 1) * V, :] = y_c + y_p


def lambda_conv1d(x, wq_f, bq, wk, wv_f, bv, emb, *, nhead, dim_k, dim_u,
                  dim_v, dim_m, batch_block=None):
    """LambdaConv1d forward (BatchNorm1d in eval mode, folded into wq_f/bq, wv_f/bv)."""
    bs, C, N = x.shape
    H, K, U, V, M = nhead, dim_k, dim_u, dim_v, dim_m
    padding = (M - 1) // 2
    HK, KU, VU = H * K, K * U, V * U
    out_ch = H * V
    f32 = jnp.float32

    if batch_block is None:
        # Whole (small) batch per grid step amortizes per-step overhead
        # (v5e/v6e).  On v7x use batch_block=1 so the 2 TCs split the batch.
        batch_block = bs if bs <= 8 else 1
    assert bs % batch_block == 0

    # --- plain-JAX layout plumbing (no hot math) ------------------------------
    # channels + a ones-row (carries the folded biases), zero-padded to 8 sublanes
    CP = ((C + 1 + 7) // 8) * 8
    w_q = jnp.concatenate([wq_f, bq, jnp.zeros((HK, CP - C - 1), f32)], axis=1)
    w_k = jnp.concatenate([wk, jnp.zeros((KU, CP - C), f32)], axis=1)
    w_v = jnp.concatenate([wv_f, bv, jnp.zeros((VU, CP - C - 1), f32)], axis=1)
    w_all = jnp.concatenate([w_q, w_k, w_v], axis=0).astype(f32)    # (HK+KU+VU, CP)

    x_aug = jnp.concatenate(
        [x.astype(f32),
         jnp.ones((bs, 1, N), f32),
         jnp.zeros((bs, CP - C - 1, N), f32)], axis=1)              # (bs, CP, N)

    # embedding (K, U, M) -> (K, M*U); column index = m*U + u (matches v_win rows)
    emb2d = jnp.transpose(emb, (0, 2, 1)).reshape(K, M * U).astype(f32)

    kernel = functools.partial(
        _lambda_conv1d_kernel, nhead=H, dim_k=K, dim_u=U, dim_v=V, dim_m=M,
        padding=padding)

    return pl.pallas_call(
        kernel,
        out_shape=jax.ShapeDtypeStruct((bs, out_ch, N), f32),
        grid=(bs // batch_block,),
        in_specs=[
            pl.BlockSpec((batch_block, CP, N), lambda b: (b, 0, 0)),   # x (+ones row)
            pl.BlockSpec((HK + KU + VU, CP), lambda b: (0, 0)),        # fused weights (resident)
            pl.BlockSpec((K, M * U), lambda b: (0, 0)),                # embedding (resident)
        ],
        out_specs=pl.BlockSpec((batch_block, out_ch, N), lambda b: (b, 0, 0)),
        scratch_shapes=[pltpu.VMEM((M * U, V * N), f32)],              # im2col window
        compiler_params=pltpu.CompilerParams(
            dimension_semantics=("parallel",)),
    )(x_aug, w_all, emb2d)


def _reference(x, wq_f, bq, wk, wv_f, bv, emb, *, nhead, dim_k, dim_u, dim_v, dim_m):
    """Pure-JAX reference (precision=HIGHEST) mirroring the PyTorch module."""
    hp = jax.lax.Precision.HIGHEST
    bs, C, N = x.shape
    padding = (dim_m - 1) // 2
    q = jnp.einsum('oc,bcn->bon', wq_f, x, precision=hp) + bq[None]
    k = jax.nn.softmax(jnp.einsum('oc,bcn->bon', wk, x, precision=hp), axis=-1)
    v = jnp.einsum('oc,bcn->bon', wv_f, x, precision=hp) + bv[None]
    q3 = q.reshape(bs, nhead, dim_k, N)
    k3 = k.reshape(bs, dim_k, dim_u, N)
    v3 = v.reshape(bs, dim_v, dim_u, N)
    lambda_c = jnp.einsum('bkun,bvun->bkv', k3, v3, precision=hp)
    y_c = jnp.einsum('bhkn,bkv->bhvn', q3, lambda_c, precision=hp)
    v_b = v.reshape(bs, dim_u, dim_v, N)
    v_pad = jnp.pad(v_b, ((0, 0), (0, 0), (0, 0), (padding, padding)))
    lambda_p = jnp.zeros((bs, dim_k, dim_v, N), jnp.float32)
    for m in range(dim_m):
        lambda_p = lambda_p + jnp.einsum('ku,buvn->bkvn', emb[:, :, m],
                                         v_pad[:, :, :, m:m + N], precision=hp)
    y_p = jnp.einsum('bhkn,bkvn->bhvn', q3, lambda_p, precision=hp)
    return (y_c + y_p).reshape(bs, nhead * dim_v, N)


def _run_case(seed, in_ch, out_ch, nhead, dim_k, dim_u, dim_m, bs, seqlen):
    dim_v = out_ch // nhead
    eps = 1e-5
    ks = jax.random.split(jax.random.PRNGKey(seed), 13)

    x = jax.random.normal(ks[0], (bs, in_ch, seqlen), jnp.float32)
    wq = jax.random.normal(ks[1], (dim_k * nhead, in_ch), jnp.float32) * 0.2
    wk = jax.random.normal(ks[2], (dim_k * dim_u, in_ch), jnp.float32) * 0.2
    wv = jax.random.normal(ks[3], (dim_v * dim_u, in_ch), jnp.float32) * 0.2

    # BatchNorm1d params (eval mode), folded into weight + per-channel bias
    g_q = jax.random.uniform(ks[4], (dim_k * nhead,), jnp.float32, 0.5, 1.5)
    b_q = jax.random.normal(ks[5], (dim_k * nhead,), jnp.float32) * 0.1
    m_q = jax.random.normal(ks[6], (dim_k * nhead,), jnp.float32) * 0.1
    v_q = jax.random.uniform(ks[7], (dim_k * nhead,), jnp.float32, 0.5, 1.5)
    g_v = jax.random.uniform(ks[8], (dim_v * dim_u,), jnp.float32, 0.5, 1.5)
    b_v = jax.random.normal(ks[9], (dim_v * dim_u,), jnp.float32) * 0.1
    m_v = jax.random.normal(ks[10], (dim_v * dim_u,), jnp.float32) * 0.1
    v_v = jax.random.uniform(ks[11], (dim_v * dim_u,), jnp.float32, 0.5, 1.5)

    sc_q = g_q / jnp.sqrt(v_q + eps)
    wq_f = wq * sc_q[:, None]
    bq = (b_q - m_q * sc_q)[:, None]                  # (H*K, 1)
    sc_v = g_v / jnp.sqrt(v_v + eps)
    wv_f = wv * sc_v[:, None]
    bv = (b_v - m_v * sc_v)[:, None]                  # (V*U, 1)

    # embedding: nn.Parameter(randn([dim_k, dim_u, 1, dim_m])) -> drop kH dim
    emb = jax.random.normal(ks[12], (dim_k, dim_u, 1, dim_m), jnp.float32)[:, :, 0, :]

    out = lambda_conv1d(x, wq_f, bq, wk, wv_f, bv, emb,
                        nhead=nhead, dim_k=dim_k, dim_u=dim_u,
                        dim_v=dim_v, dim_m=dim_m)
    out = jax.block_until_ready(out)

    ref = _reference(x, wq_f, bq, wk, wv_f, bv, emb,
                     nhead=nhead, dim_k=dim_k, dim_u=dim_u,
                     dim_v=dim_v, dim_m=dim_m)
    assert out.shape == (bs, out_ch, seqlen)
    assert bool(jnp.all(jnp.isfinite(out)))
    err = float(jnp.max(jnp.abs(out - ref)))
    scale = float(jnp.max(jnp.abs(ref)))
    assert err <= 2e-2 * max(1.0, scale), (err, scale)


if __name__ == "__main__":
    # module-default config (dim_u == dim_v == 4)
    _run_case(seed=0, in_ch=4, out_ch=8, nhead=2, dim_k=16, dim_u=4, dim_m=7,
              bs=2, seqlen=128)
    # dim_u != dim_v: validates the two different channel groupings of `values`
    # (values.view(bs,V,U,N) for lambda_c vs values.view(bs,U,V,N) for lambda_p)
    _run_case(seed=1, in_ch=4, out_ch=12, nhead=2, dim_k=16, dim_u=4, dim_m=7,
              bs=2, seqlen=128)
    print("KERNEL_OK")
</pallas_src>

<mosaic_0001>
module attributes {stable_mosaic.version = 11 : i64} {
  func.func @_lambda_conv1d_kernel(%arg0: i32, %arg1: memref<2x8x128xf32, #tpu.memory_space<vmem>>, %arg2: memref<112x8xf32, #tpu.memory_space<vmem>>, %arg3: memref<16x28xf32, #tpu.memory_space<vmem>>, %arg4: memref<2x8x128xf32, #tpu.memory_space<vmem>>, %arg5: memref<28x512xf32, #tpu.memory_space<vmem>>) attributes {dimension_semantics = [#tpu.dimension_semantics<parallel>], iteration_bounds = array<i64: 1>, scalar_prefetch = 0 : i64, scratch_operands = 1 : i64, tpu.core_type = #tpu.core_type<tc>, window_params = [{transform_indices = @transform_0, window_bounds = array<i64: 2, 8, 128>}, {pipeline_mode = #tpu.pipeline_mode<synchronous>, transform_indices = @transform_1, window_bounds = array<i64: 112, 8>}, {pipeline_mode = #tpu.pipeline_mode<synchronous>, transform_indices = @transform_2, window_bounds = array<i64: 16, 28>}, {transform_indices = @transform_3, window_bounds = array<i64: 2, 8, 128>}]} {
    %0 = tpu.iota {dimensions = array<i32: 1>} : vector<4x512xi32>
    %c127_i32 = arith.constant 127 : i32
    %1 = vector.broadcast %c127_i32 : i32 to vector<4x512xi32>
    %2 = arith.andi %0, %1 : vector<4x512xi32>
    %c0 = arith.constant 0 : index
    %c0_0 = arith.constant 0 : index
    %3 = vector.load %arg2[%c0, %c0_0] : memref<112x8xf32, #tpu.memory_space<vmem>>, vector<112x8xf32>
    %c0_1 = arith.constant 0 : index
    %c0_2 = arith.constant 0 : index
    %c0_3 = arith.constant 0 : index
    %4 = vector.load %arg1[%c0_1, %c0_2, %c0_3] : memref<2x8x128xf32, #tpu.memory_space<vmem>>, vector<1x8x128xf32>
    %5 = vector.shape_cast %4 : vector<1x8x128xf32> to vector<8x128xf32>
    %cst = arith.constant dense<0.000000e+00> : vector<112x128xf32>
    %6 = tpu.matmul %3, %5, %cst {dimension_numbers = #tpu.dot_dimension_numbers<[1], [0], [0], [1], [0, 0, 1, 1], [], []>} : vector<112x8xf32>, vector<8x128xf32>, vector<112x128xf32> -> vector<112x128xf32>
    %7 = vector.extract_strided_slice %6 {offsets = [0, 0], sizes = [32, 128], strides = [1, 1]} : vector<112x128xf32> to vector<32x128xf32>
    %8 = vector.extract_strided_slice %6 {offsets = [32, 0], sizes = [64, 128], strides = [1, 1]} : vector<112x128xf32> to vector<64x128xf32>
    %9 = vector.extract_strided_slice %6 {offsets = [96, 0], sizes = [16, 128], strides = [1, 1]} : vector<112x128xf32> to vector<16x128xf32>
    %cst_4 = arith.constant dense<0xFF800000> : vector<64xf32>
    %10 = vector.multi_reduction <maximumf>, %8, %cst_4 [1] : vector<64x128xf32> to vector<64xf32>
    %11 = vector.shape_cast %10 : vector<64xf32> to vector<64x1xf32>
    %12 = vector.broadcast %11 : vector<64x1xf32> to vector<64x128xf32>
    %13 = arith.subf %8, %12 : vector<64x128xf32>
    %14 = math.exp %13 : vector<64x128xf32>
    %cst_5 = arith.constant dense<0.000000e+00> : vector<64xf32>
    %15 = vector.multi_reduction <add>, %14, %cst_5 [1] : vector<64x128xf32> to vector<64xf32>
    %16 = vector.shape_cast %15 : vector<64xf32> to vector<64x1xf32>
    %17 = tpu.reciprocal %16 {approx = true} : vector<64x1xf32> -> vector<64x1xf32>
    %18 = vector.broadcast %17 : vector<64x1xf32> to vector<64x128xf32>
    %19 = arith.mulf %14, %18 : vector<64x128xf32>
    %20 = vector.shape_cast %19 : vector<64x128xf32> to vector<16x512xf32>
    %21 = vector.shape_cast %9 : vector<16x128xf32> to vector<4x512xf32>
    %cst_6 = arith.constant dense<0.000000e+00> : vector<4x16xf32>
    %22 = tpu.matmul %21, %20, %cst_6 {dimension_numbers = #tpu.dot_dimension_numbers<[1], [1], [0], [0], [0, 0, 1, 0], [], []>} : vector<4x512xf32>, vector<16x512xf32>, vector<4x16xf32> -> vector<4x16xf32>
    %23 = vector.shape_cast %9 : vector<16x128xf32> to vector<4x512xf32>
    %c3_i32 = arith.constant 3 : i32
    %24 = tpu.dynamic_rotate %23 by %c3_i32 dim 1 : vector<4x512xf32>, i32 -> vector<4x512xf32>
    %c-3_i32 = arith.constant -3 : i32
    %25 = vector.broadcast %c-3_i32 : i32 to vector<4x512xi32>
    %26 = arith.addi %2, %25 : vector<4x512xi32>
    %c0_i32 = arith.constant 0 : i32
    %27 = vector.broadcast %c0_i32 : i32 to vector<4x512xi32>
    %28 = arith.cmpi sge, %26, %27 : vector<4x512xi32>
    %c-3_i32_7 = arith.constant -3 : i32
    %29 = vector.broadcast %c-3_i32_7 : i32 to vector<4x512xi32>
    %30 = arith.addi %2, %29 : vector<4x512xi32>
    %c128_i32 = arith.constant 128 : i32
    %31 = vector.broadcast %c128_i32 : i32 to vector<4x512xi32>
    %32 = arith.cmpi slt, %30, %31 : vector<4x512xi32>
    %33 = arith.andi %28, %32 : vector<4x512xi1>
    %cst_8 = arith.constant 0.000000e+00 : f32
    %34 = vector.broadcast %cst_8 : f32 to vector<4x512xf32>
    %35 = arith.select %33, %24, %34 : vector<4x512xi1>, vector<4x512xf32>
    %c0_9 = arith.constant 0 : index
    %c0_10 = arith.constant 0 : index
    %36 = vector.load %arg5[%c0_9, %c0_10] : memref<28x512xf32, #tpu.memory_space<vmem>>, vector<4x512xf32>
    tpu.vector_store %arg5[%c0_9, %c0_10], %35 {strides = array<i32>} : memref<28x512xf32, #tpu.memory_space<vmem>>, vector<4x512xf32>,
    %c2_i32 = arith.constant 2 : i32
    %37 = tpu.dynamic_rotate %23 by %c2_i32 dim 1 : vector<4x512xf32>, i32 -> vector<4x512xf32>
    %c-2_i32 = arith.constant -2 : i32
    %38 = vector.broadcast %c-2_i32 : i32 to vector<4x512xi32>
    %39 = arith.addi %2, %38 : vector<4x512xi32>
    %c0_i32_11 = arith.constant 0 : i32
    %40 = vector.broadcast %c0_i32_11 : i32 to vector<4x512xi32>
    %41 = arith.cmpi sge, %39, %40 : vector<4x512xi32>
    %c-2_i32_12 = arith.constant -2 : i32
    %42 = vector.broadcast %c-2_i32_12 : i32 to vector<4x512xi32>
    %43 = arith.addi %2, %42 : vector<4x512xi32>
    %c128_i32_13 = arith.constant 128 : i32
    %44 = vector.broadcast %c128_i32_13 : i32 to vector<4x512xi32>
    %45 = arith.cmpi slt, %43, %44 : vector<4x512xi32>
    %46 = arith.andi %41, %45 : vector<4x512xi1>
    %cst_14 = arith.constant 0.000000e+00 : f32
    %47 = vector.broadcast %cst_14 : f32 to vector<4x512xf32>
    %48 = arith.select %46, %37, %47 : vector<4x512xi1>, vector<4x512xf32>
    %c4 = arith.constant 4 : index
    %c0_15 = arith.constant 0 : index
    %49 = vector.load %arg5[%c4, %c0_15] : memref<28x512xf32, #tpu.memory_space<vmem>>, vector<4x512xf32>
    tpu.vector_store %arg5[%c4, %c0_15], %48 {strides = array<i32>} : memref<28x512xf32, #tpu.memory_space<vmem>>, vector<4x512xf32>,
    %c1_i32 = arith.constant 1 : i32
    %50 = tpu.dynamic_rotate %23 by %c1_i32 dim 1 : vector<4x512xf32>, i32 -> vector<4x512xf32>
    %c-1_i32 = arith.constant -1 : i32
    %51 = vector.broadcast %c-1_i32 : i32 to vector<4x512xi32>
    %52 = arith.addi %2, %51 : vector<4x512xi32>
    %c0_i32_16 = arith.constant 0 : i32
    %53 = vector.broadcast %c0_i32_16 : i32 to vector<4x512xi32>
    %54 = arith.cmpi sge, %52, %53 : vector<4x512xi32>
    %c-1_i32_17 = arith.constant -1 : i32
    %55 = vector.broadcast %c-1_i32_17 : i32 to vector<4x512xi32>
    %56 = arith.addi %2, %55 : vector<4x512xi32>
    %c128_i32_18 = arith.constant 128 : i32
    %57 = vector.broadcast %c128_i32_18 : i32 to vector<4x512xi32>
    %58 = arith.cmpi slt, %56, %57 : vector<4x512xi32>
    %59 = arith.andi %54, %58 : vector<4x512xi1>
    %cst_19 = arith.constant 0.000000e+00 : f32
    %60 = vector.broadcast %cst_19 : f32 to vector<4x512xf32>
    %61 = arith.select %59, %50, %60 : vector<4x512xi1>, vector<4x512xf32>
    %c8 = arith.constant 8 : index
    %c0_20 = arith.constant 0 : index
    %62 = vector.load %arg5[%c8, %c0_20] : memref<28x512xf32, #tpu.memory_space<vmem>>, vector<4x512xf32>
    tpu.vector_store %arg5[%c8, %c0_20], %61 {strides = array<i32>} : memref<28x512xf32, #tpu.memory_space<vmem>>, vector<4x512xf32>,
    %c12 = arith.constant 12 : index
    %c0_21 = arith.constant 0 : index
    %63 = vector.load %arg5[%c12, %c0_21] : memref<28x512xf32, #tpu.memory_space<vmem>>, vector<4x512xf32>
    tpu.vector_store %arg5[%c12, %c0_21], %23 {strides = array<i32>} : memref<28x512xf32, #tpu.memory_space<vmem>>, vector<4x512xf32>,
    %c511_i32 = arith.constant 511 : i32
    %64 = tpu.dynamic_rotate %23 by %c511_i32 dim 1 : vector<4x512xf32>, i32 -> vector<4x512xf32>
    %c1_i32_22 = arith.constant 1 : i32
    %65 = vector.broadcast %c1_i32_22 : i32 to vector<4x512xi32>
    %66 = arith.addi %2, %65 : vector<4x512xi32>
    %c0_i32_23 = arith.constant 0 : i32
    %67 = vector.broadcast %c0_i32_23 : i32 to vector<4x512xi32>
    %68 = arith.cmpi sge, %66, %67 : vector<4x512xi32>
    %c1_i32_24 = arith.constant 1 : i32
    %69 = vector.broadcast %c1_i32_24 : i32 to vector<4x512xi32>
    %70 = arith.addi %2, %69 : vector<4x512xi32>
    %c128_i32_25 = arith.constant 128 : i32
    %71 = vector.broadcast %c128_i32_25 : i32 to vector<4x512xi32>
    %72 = arith.cmpi slt, %70, %71 : vector<4x512xi32>
    %73 = arith.andi %68, %72 : vector<4x512xi1>
    %cst_26 = arith.constant 0.000000e+00 : f32
    %74 = vector.broadcast %cst_26 : f32 to vector<4x512xf32>
    %75 = arith.select %73, %64, %74 : vector<4x512xi1>, vector<4x512xf32>
    %c16 = arith.constant 16 : index
    %c0_27 = arith.constant 0 : index
    %76 = vector.load %arg5[%c16, %c0_27] : memref<28x512xf32, #tpu.memory_space<vmem>>, vector<4x512xf32>
    tpu.vector_store %arg5[%c16, %c0_27], %75 {strides = array<i32>} : memref<28x512xf32, #tpu.memory_space<vmem>>, vector<4x512xf32>,
    %c510_i32 = arith.constant 510 : i32
    %77 = tpu.dynamic_rotate %23 by %c510_i32 dim 1 : vector<4x512xf32>, i32 -> vector<4x512xf32>
    %c2_i32_28 = arith.constant 2 : i32
    %78 = vector.broadcast %c2_i32_28 : i32 to vector<4x512xi32>
    %79 = arith.addi %2, %78 : vector<4x512xi32>
    %c0_i32_29 = arith.constant 0 : i32
    %80 = vector.broadcast %c0_i32_29 : i32 to vector<4x512xi32>
    %81 = arith.cmpi sge, %79, %80 : vector<4x512xi32>
    %c2_i32_30 = arith.constant 2 : i32
    %82 = vector.broadcast %c2_i32_30 : i32 to vector<4x512xi32>
    %83 = arith.addi %2, %82 : vector<4x512xi32>
    %c128_i32_31 = arith.constant 128 : i32
    %84 = vector.broadcast %c128_i32_31 : i32 to vector<4x512xi32>
    %85 = arith.cmpi slt, %83, %84 : vector<4x512xi32>
    %86 = arith.andi %81, %85 : vector<4x512xi1>
    %cst_32 = arith.constant 0.000000e+00 : f32
    %87 = vector.broadcast %cst_32 : f32 to vector<4x512xf32>
    %88 = arith.select %86, %77, %87 : vector<4x512xi1>, vector<4x512xf32>
    %c20 = arith.constant 20 : index
    %c0_33 = arith.constant 0 : index
    %89 = vector.load %arg5[%c20, %c0_33] : memref<28x512xf32, #tpu.memory_space<vmem>>, vector<4x512xf32>
    tpu.vector_store %arg5[%c20, %c0_33], %88 {strides = array<i32>} : memref<28x512xf32, #tpu.memory_space<vmem>>, vector<4x512xf32>,
    %c509_i32 = arith.constant 509 : i32
    %90 = tpu.dynamic_rotate %23 by %c509_i32 dim 1 : vector<4x512xf32>, i32 -> vector<4x512xf32>
    %c3_i32_34 = arith.constant 3 : i32
    %91 = vector.broadcast %c3_i32_34 : i32 to vector<4x512xi32>
    %92 = arith.addi %2, %91 : vector<4x512xi32>
    %c0_i32_35 = arith.constant 0 : i32
    %93 = vector.broadcast %c0_i32_35 : i32 to vector<4x512xi32>
    %94 = arith.cmpi sge, %92, %93 : vector<4x512xi32>
    %c3_i32_36 = arith.constant 3 : i32
    %95 = vector.broadcast %c3_i32_36 : i32 to vector<4x512xi32>
    %96 = arith.addi %2, %95 : vector<4x512xi32>
    %c128_i32_37 = arith.constant 128 : i32
    %97 = vector.broadcast %c128_i32_37 : i32 to vector<4x512xi32>
    %98 = arith.cmpi slt, %96, %97 : vector<4x512xi32>
    %99 = arith.andi %94, %98 : vector<4x512xi1>
    %cst_38 = arith.constant 0.000000e+00 : f32
    %100 = vector.broadcast %cst_38 : f32 to vector<4x512xf32>
    %101 = arith.select %99, %90, %100 : vector<4x512xi1>, vector<4x512xf32>
    %c24 = arith.constant 24 : index
    %c0_39 = arith.constant 0 : index
    %102 = vector.load %arg5[%c24, %c0_39] : memref<28x512xf32, #tpu.memory_space<vmem>>, vector<4x512xf32>
    tpu.vector_store %arg5[%c24, %c0_39], %101 {strides = array<i32>} : memref<28x512xf32, #tpu.memory_space<vmem>>, vector<4x512xf32>,
    %c0_40 = arith.constant 0 : index
    %c0_41 = arith.constant 0 : index
    %103 = vector.load %arg3[%c0_40, %c0_41] : memref<16x28xf32, #tpu.memory_space<vmem>>, vector<16x28xf32>
    %c0_42 = arith.constant 0 : index
    %c0_43 = arith.constant 0 : index
    %104 = vector.load %arg5[%c0_42, %c0_43] : memref<28x512xf32, #tpu.memory_space<vmem>>, vector<28x512xf32>
    %cst_44 = arith.constant dense<0.000000e+00> : vector<16x512xf32>
    %105 = tpu.matmul %103, %104, %cst_44 {dimension_numbers = #tpu.dot_dimension_numbers<[1], [0], [0], [1], [0, 0, 1, 1], [], []>} : vector<16x28xf32>, vector<28x512xf32>, vector<16x512xf32> -> vector<16x512xf32>
    %106 = vector.extract_strided_slice %7 {offsets = [0, 0], sizes = [16, 128], strides = [1, 1]} : vector<32x128xf32> to vector<16x128xf32>
    %cst_45 = arith.constant dense<0.000000e+00> : vector<4x128xf32>
    %107 = tpu.matmul %22, %106, %cst_45 {dimension_numbers = #tpu.dot_dimension_numbers<[1], [0], [0], [1], [0, 0, 1, 1], [], []>} : vector<4x16xf32>, vector<16x128xf32>, vector<4x128xf32> -> vector<4x128xf32>
    %108 = tpu.concatenate %106, %106, %106, %106 in 1 : vector<16x128xf32>, vector<16x128xf32>, vector<16x128xf32>, vector<16x128xf32> -> vector<16x512xf32>
    %109 = arith.mulf %108, %105 : vector<16x512xf32>
    %cst_46 = arith.constant dense<0.000000e+00> : vector<512xf32>
    %110 = vector.multi_reduction <add>, %109, %cst_46 [0] : vector<16x512xf32> to vector<512xf32>
    %111 = vector.shape_cast %110 : vector<512xf32> to vector<1x512xf32>
    %112 = vector.shape_cast %111 : vector<1x512xf32> to vector<4x128xf32>
    %113 = arith.addf %107, %112 : vector<4x128xf32>
    %c0_47 = arith.constant 0 : index
    %c0_48 = arith.constant 0 : index
    %c0_49 = arith.constant 0 : index
    %114 = vector.load %arg4[%c0_47, %c0_48, %c0_49] : memref<2x8x128xf32, #tpu.memory_space<vmem>>, vector<1x4x128xf32>
    %115 = vector.shape_cast %114 : vector<1x4x128xf32> to vector<4x128xf32>
    %116 = vector.shape_cast %113 : vector<4x128xf32> to vector<1x4x128xf32>
    tpu.vector_store %arg4[%c0_47, %c0_48, %c0_49], %116 {strides = array<i32>} : memref<2x8x128xf32, #tpu.memory_space<vmem>>, vector<1x4x128xf32>,
    %117 = vector.extract_strided_slice %7 {offsets = [16, 0], sizes = [16, 128], strides = [1, 1]} : vector<32x128xf32> to vector<16x128xf32>
    %cst_50 = arith.constant dense<0.000000e+00> : vector<4x128xf32>
    %118 = tpu.matmul %22, %117, %cst_50 {dimension_numbers = #tpu.dot_dimension_numbers<[1], [0], [0], [1], [0, 0, 1, 1], [], []>} : vector<4x16xf32>, vector<16x128xf32>, vector<4x128xf32> -> vector<4x128xf32>
    %119 = tpu.concatenate %117, %117, %117, %117 in 1 : vector<16x128xf32>, vector<16x128xf32>, vector<16x128xf32>, vector<16x128xf32> -> vector<16x512xf32>
    %120 = arith.mulf %119, %105 : vector<16x512xf32>
    %cst_51 = arith.constant dense<0.000000e+00> : vector<512xf32>
    %121 = vector.multi_reduction <add>, %120, %cst_51 [0] : vector<16x512xf32> to vector<512xf32>
    %122 = vector.shape_cast %121 : vector<512xf32> to vector<1x512xf32>
    %123 = vector.shape_cast %122 : vector<1x512xf32> to vector<4x128xf32>
    %124 = arith.addf %118, %123 : vector<4x128xf32>
    %c0_52 = arith.constant 0 : index
    %c4_53 = arith.constant 4 : index
    %c0_54 = arith.constant 0 : index
    %125 = vector.load %arg4[%c0_52, %c4_53, %c0_54] : memref<2x8x128xf32, #tpu.memory_space<vmem>>, vector<1x4x128xf32>
    %126 = vector.shape_cast %125 : vector<1x4x128xf32> to vector<4x128xf32>
    %127 = vector.shape_cast %124 : vector<4x128xf32> to vector<1x4x128xf32>
    tpu.vector_store %arg4[%c0_52, %c4_53, %c0_54], %127 {strides = array<i32>} : memref<2x8x128xf32, #tpu.memory_space<vmem>>, vector<1x4x128xf32>,
    %c0_55 = arith.constant 0 : index
    %c0_56 = arith.constant 0 : index
    %128 = vector.load %arg2[%c0_55, %c0_56] : memref<112x8xf32, #tpu.memory_space<vmem>>, vector<112x8xf32>
    %c1 = arith.constant 1 : index
    %c0_57 = arith.constant 0 : index
    %c0_58 = arith.constant 0 : index
    %129 = vector.load %arg1[%c1, %c0_57, %c0_58] : memref<2x8x128xf32, #tpu.memory_space<vmem>>, vector<1x8x128xf32>
    %130 = vector.shape_cast %129 : vector<1x8x128xf32> to vector<8x128xf32>
    %cst_59 = arith.constant dense<0.000000e+00> : vector<112x128xf32>
    %131 = tpu.matmul %128, %130, %cst_59 {dimension_numbers = #tpu.dot_dimension_numbers<[1], [0], [0], [1], [0, 0, 1, 1], [], []>} : vector<112x8xf32>, vector<8x128xf32>, vector<112x128xf32> -> vector<112x128xf32>
    %132 = vector.extract_strided_slice %131 {offsets = [0, 0], sizes = [32, 128], strides = [1, 1]} : vector<112x128xf32> to vector<32x128xf32>
    %133 = vector.extract_strided_slice %131 {offsets = [32, 0], sizes = [64, 128], strides = [1, 1]} : vector<112x128xf32> to vector<64x128xf32>
    %134 = vector.extract_strided_slice %131 {offsets = [96, 0], sizes = [16, 128], strides = [1, 1]} : vector<112x128xf32> to vector<16x128xf32>
    %cst_60 = arith.constant dense<0xFF800000> : vector<64xf32>
    %135 = vector.multi_reduction <maximumf>, %133, %cst_60 [1] : vector<64x128xf32> to vector<64xf32>
    %136 = vector.shape_cast %135 : vector<64xf32> to vector<64x1xf32>
    %137 = vector.broadcast %136 : vector<64x1xf32> to vector<64x128xf32>
    %138 = arith.subf %133, %137 : vector<64x128xf32>
    %139 = math.exp %138 : vector<64x128xf32>
    %cst_61 = arith.constant dense<0.000000e+00> : vector<64xf32>
    %140 = vector.multi_reduction <add>, %139, %cst_61 [1] : vector<64x128xf32> to vector<64xf32>
    %141 = vector.shape_cast %140 : vector<64xf32> to vector<64x1xf32>
    %142 = tpu.reciprocal %141 {approx = true} : vector<64x1xf32> -> vector<64x1xf32>
    %143 = vector.broadcast %142 : vector<64x1xf32> to vector<64x128xf32>
    %144 = arith.mulf %139, %143 : vector<64x128xf32>
    %145 = vector.shape_cast %144 : vector<64x128xf32> to vector<16x512xf32>
    %146 = vector.shape_cast %134 : vector<16x128xf32> to vector<4x512xf32>
    %cst_62 = arith.constant dense<0.000000e+00> : vector<4x16xf32>
    %147 = tpu.matmul %146, %145, %cst_62 {dimension_numbers = #tpu.dot_dimension_numbers<[1], [1], [0], [0], [0, 0, 1, 0], [], []>} : vector<4x512xf32>, vector<16x512xf32>, vector<4x16xf32> -> vector<4x16xf32>
    %148 = vector.shape_cast %134 : vector<16x128xf32> to vector<4x512xf32>
    %c3_i32_63 = arith.constant 3 : i32
    %149 = tpu.dynamic_rotate %148 by %c3_i32_63 dim 1 : vector<4x512xf32>, i32 -> vector<4x512xf32>
    %c-3_i32_64 = arith.constant -3 : i32
    %150 = vector.broadcast %c-3_i32_64 : i32 to vector<4x512xi32>
    %151 = arith.addi %2, %150 : vector<4x512xi32>
    %c0_i32_65 = arith.constant 0 : i32
    %152 = vector.broadcast %c0_i32_65 : i32 to vector<4x512xi32>
    %153 = arith.cmpi sge, %151, %152 : vector<4x512xi32>
    %c-3_i32_66 = arith.constant -3 : i32
    %154 = vector.broadcast %c-3_i32_66 : i32 to vector<4x512xi32>
    %155 = arith.addi %2, %154 : vector<4x512xi32>
    %c128_i32_67 = arith.constant 128 : i32
    %156 = vector.broadcast %c128_i32_67 : i32 to vector<4x512xi32>
    %157 = arith.cmpi slt, %155, %156 : vector<4x512xi32>
    %158 = arith.andi %153, %157 : vector<4x512xi1>
    %cst_68 = arith.constant 0.000000e+00 : f32
    %159 = vector.broadcast %cst_68 : f32 to vector<4x512xf32>
    %160 = arith.select %158, %149, %159 : vector<4x512xi1>, vector<4x512xf32>
    %c0_69 = arith.constant 0 : index
    %c0_70 = arith.constant 0 : index
    %161 = vector.load %arg5[%c0_69, %c0_70] : memref<28x512xf32, #tpu.memory_space<vmem>>, vector<4x512xf32>
    tpu.vector_store %arg5[%c0_69, %c0_70], %160 {strides = array<i32>} : memref<28x512xf32, #tpu.memory_space<vmem>>, vector<4x512xf32>,
    %c2_i32_71 = arith.constant 2 : i32
    %162 = tpu.dynamic_rotate %148 by %c2_i32_71 dim 1 : vector<4x512xf32>, i32 -> vector<4x512xf32>
    %c-2_i32_72 = arith.constant -2 : i32
    %163 = vector.broadcast %c-2_i32_72 : i32 to vector<4x512xi32>
    %164 = arith.addi %2, %163 : vector<4x512xi32>
    %c0_i32_73 = arith.constant 0 : i32
    %165 = vector.broadcast %c0_i32_73 : i32 to vector<4x512xi32>
    %166 = arith.cmpi sge, %164, %165 : vector<4x512xi32>
    %c-2_i32_74 = arith.constant -2 : i32
    %167 = vector.broadcast %c-2_i32_74 : i32 to vector<4x512xi32>
    %168 = arith.addi %2, %167 : vector<4x512xi32>
    %c128_i32_75 = arith.constant 128 : i32
    %169 = vector.broadcast %c128_i32_75 : i32 to vector<4x512xi32>
    %170 = arith.cmpi slt, %168, %169 : vector<4x512xi32>
    %171 = arith.andi %166, %170 : vector<4x512xi1>
    %cst_76 = arith.constant 0.000000e+00 : f32
    %172 = vector.broadcast %cst_76 : f32 to vector<4x512xf32>
    %173 = arith.select %171, %162, %172 : vector<4x512xi1>, vector<4x512xf32>
    %c4_77 = arith.constant 4 : index
    %c0_78 = arith.constant 0 : index
    %174 = vector.load %arg5[%c4_77, %c0_78] : memref<28x512xf32, #tpu.memory_space<vmem>>, vector<4x512xf32>
    tpu.vector_store %arg5[%c4_77, %c0_78], %173 {strides = array<i32>} : memref<28x512xf32, #tpu.memory_space<vmem>>, vector<4x512xf32>,
    %c1_i32_79 = arith.constant 1 : i32
    %175 = tpu.dynamic_rotate %148 by %c1_i32_79 dim 1 : vector<4x512xf32>, i32 -> vector<4x512xf32>
    %c-1_i32_80 = arith.constant -1 : i32
    %176 = vector.broadcast %c-1_i32_80 : i32 to vector<4x512xi32>
    %177 = arith.addi %2, %176 : vector<4x512xi32>
    %c0_i32_81 = arith.constant 0 : i32
    %178 = vector.broadcast %c0_i32_81 : i32 to vector<4x512xi32>
    %179 = arith.cmpi sge, %177, %178 : vector<4x512xi32>
    %c-1_i32_82 = arith.constant -1 : i32
    %180 = vector.broadcast %c-1_i32_82 : i32 to vector<4x512xi32>
    %181 = arith.addi %2, %180 : vector<4x512xi32>
    %c128_i32_83 = arith.constant 128 : i32
    %182 = vector.broadcast %c128_i32_83 : i32 to vector<4x512xi32>
    %183 = arith.cmpi slt, %181, %182 : vector<4x512xi32>
    %184 = arith.andi %179, %183 : vector<4x512xi1>
    %cst_84 = arith.constant 0.000000e+00 : f32
    %185 = vector.broadcast %cst_84 : f32 to vector<4x512xf32>
    %186 = arith.select %184, %175, %185 : vector<4x512xi1>, vector<4x512xf32>
    %c8_85 = arith.constant 8 : index
    %c0_86 = arith.constant 0 : index
    %187 = vector.load %arg5[%c8_85, %c0_86] : memref<28x512xf32, #tpu.memory_space<vmem>>, vector<4x512xf32>
    tpu.vector_store %arg5[%c8_85, %c0_86], %186 {strides = array<i32>} : memref<28x512xf32, #tpu.memory_space<vmem>>, vector<4x512xf32>,
    %c12_87 = arith.constant 12 : index
    %c0_88 = arith.constant 0 : index
    %188 = vector.load %arg5[%c12_87, %c0_88] : memref<28x512xf32, #tpu.memory_space<vmem>>, vector<4x512xf32>
    tpu.vector_store %arg5[%c12_87, %c0_88], %148 {strides = array<i32>} : memref<28x512xf32, #tpu.memory_space<vmem>>, vector<4x512xf32>,
    %c511_i32_89 = arith.constant 511 : i32
    %189 = tpu.dynamic_rotate %148 by %c511_i32_89 dim 1 : vector<4x512xf32>, i32 -> vector<4x512xf32>
    %c1_i32_90 = arith.constant 1 : i32
    %190 = vector.broadcast %c1_i32_90 : i32 to vector<4x512xi32>
    %191 = arith.addi %2, %190 : vector<4x512xi32>
    %c0_i32_91 = arith.constant 0 : i32
    %192 = vector.broadcast %c0_i32_91 : i32 to vector<4x512xi32>
    %193 = arith.cmpi sge, %191, %192 : vector<4x512xi32>
    %c1_i32_92 = arith.constant 1 : i32
    %194 = vector.broadcast %c1_i32_92 : i32 to vector<4x512xi32>
    %195 = arith.addi %2, %194 : vector<4x512xi32>
    %c128_i32_93 = arith.constant 128 : i32
    %196 = vector.broadcast %c128_i32_93 : i32 to vector<4x512xi32>
    %197 = arith.cmpi slt, %195, %196 : vector<4x512xi32>
    %198 = arith.andi %193, %197 : vector<4x512xi1>
    %cst_94 = arith.constant 0.000000e+00 : f32
    %199 = vector.broadcast %cst_94 : f32 to vector<4x512xf32>
    %200 = arith.select %198, %189, %199 : vector<4x512xi1>, vector<4x512xf32>
    %c16_95 = arith.constant 16 : index
    %c0_96 = arith.constant 0 : index
    %201 = vector.load %arg5[%c16_95, %c0_96] : memref<28x512xf32, #tpu.memory_space<vmem>>, vector<4x512xf32>
    tpu.vector_store %arg5[%c16_95, %c0_96], %200 {strides = array<i32>} : memref<28x512xf32, #tpu.memory_space<vmem>>, vector<4x512xf32>,
    %c510_i32_97 = arith.constant 510 : i32
    %202 = tpu.dynamic_rotate %148 by %c510_i32_97 dim 1 : vector<4x512xf32>, i32 -> vector<4x512xf32>
    %c2_i32_98 = arith.constant 2 : i32
    %203 = vector.broadcast %c2_i32_98 : i32 to vector<4x512xi32>
    %204 = arith.addi %2, %203 : vector<4x512xi32>
    %c0_i32_99 = arith.constant 0 : i32
    %205 = vector.broadcast %c0_i32_99 : i32 to vector<4x512xi32>
    %206 = arith.cmpi sge, %204, %205 : vector<4x512xi32>
    %c2_i32_100 = arith.constant 2 : i32
    %207 = vector.broadcast %c2_i32_100 : i32 to vector<4x512xi32>
    %208 = arith.addi %2, %207 : vector<4x512xi32>
    %c128_i32_101 = arith.constant 128 : i32
    %209 = vector.broadcast %c128_i32_101 : i32 to vector<4x512xi32>
    %210 = arith.cmpi slt, %208, %209 : vector<4x512xi32>
    %211 = arith.andi %206, %210 : vector<4x512xi1>
    %cst_102 = arith.constant 0.000000e+00 : f32
    %212 = vector.broadcast %cst_102 : f32 to vector<4x512xf32>
    %213 = arith.select %211, %202, %212 : vector<4x512xi1>, vector<4x512xf32>
    %c20_103 = arith.constant 20 : index
    %c0_104 = arith.constant 0 : index
    %214 = vector.load %arg5[%c20_103, %c0_104] : memref<28x512xf32, #tpu.memory_space<vmem>>, vector<4x512xf32>
    tpu.vector_store %arg5[%c20_103, %c0_104], %213 {strides = array<i32>} : memref<28x512xf32, #tpu.memory_space<vmem>>, vector<4x512xf32>,
    %c509_i32_105 = arith.constant 509 : i32
    %215 = tpu.dynamic_rotate %148 by %c509_i32_105 dim 1 : vector<4x512xf32>, i32 -> vector<4x512xf32>
    %c3_i32_106 = arith.constant 3 : i32
    %216 = vector.broadcast %c3_i32_106 : i32 to vector<4x512xi32>
    %217 = arith.addi %2, %216 : vector<4x512xi32>
    %c0_i32_107 = arith.constant 0 : i32
    %218 = vector.broadcast %c0_i32_107 : i32 to vector<4x512xi32>
    %219 = arith.cmpi sge, %217, %218 : vector<4x512xi32>
    %c3_i32_108 = arith.constant 3 : i32
    %220 = vector.broadcast %c3_i32_108 : i32 to vector<4x512xi32>
    %221 = arith.addi %2, %220 : vector<4x512xi32>
    %c128_i32_109 = arith.constant 128 : i32
    %222 = vector.broadcast %c128_i32_109 : i32 to vector<4x512xi32>
    %223 = arith.cmpi slt, %221, %222 : vector<4x512xi32>
    %224 = arith.andi %219, %223 : vector<4x512xi1>
    %cst_110 = arith.constant 0.000000e+00 : f32
    %225 = vector.broadcast %cst_110 : f32 to vector<4x512xf32>
    %226 = arith.select %224, %215, %225 : vector<4x512xi1>, vector<4x512xf32>
    %c24_111 = arith.constant 24 : index
    %c0_112 = arith.constant 0 : index
    %227 = vector.load %arg5[%c24_111, %c0_112] : memref<28x512xf32, #tpu.memory_space<vmem>>, vector<4x512xf32>
    tpu.vector_store %arg5[%c24_111, %c0_112], %226 {strides = array<i32>} : memref<28x512xf32, #tpu.memory_space<vmem>>, vector<4x512xf32>,
    %c0_113 = arith.constant 0 : index
    %c0_114 = arith.constant 0 : index
    %228 = vector.load %arg3[%c0_113, %c0_114] : memref<16x28xf32, #tpu.memory_space<vmem>>, vector<16x28xf32>
    %c0_115 = arith.constant 0 : index
    %c0_116 = arith.constant 0 : index
    %229 = vector.load %arg5[%c0_115, %c0_116] : memref<28x512xf32, #tpu.memory_space<vmem>>, vector<28x512xf32>
    %cst_117 = arith.constant dense<0.000000e+00> : vector<16x512xf32>
    %230 = tpu.matmul %228, %229, %cst_117 {dimension_numbers = #tpu.dot_dimension_numbers<[1], [0], [0], [1], [0, 0, 1, 1], [], []>} : vector<16x28xf32>, vector<28x512xf32>, vector<16x512xf32> -> vector<16x512xf32>
    %231 = vector.extract_strided_slice %132 {offsets = [0, 0], sizes = [16, 128], strides = [1, 1]} : vector<32x128xf32> to vector<16x128xf32>
    %cst_118 = arith.constant dense<0.000000e+00> : vector<4x128xf32>
    %232 = tpu.matmul %147, %231, %cst_118 {dimension_numbers = #tpu.dot_dimension_numbers<[1], [0], [0], [1], [0, 0, 1, 1], [], []>} : vector<4x16xf32>, vector<16x128xf32>, vector<4x128xf32> -> vector<4x128xf32>
    %233 = tpu.concatenate %231, %231, %231, %231 in 1 : vector<16x128xf32>, vector<16x128xf32>, vector<16x128xf32>, vector<16x128xf32> -> vector<16x512xf32>
    %234 = arith.mulf %233, %230 : vector<16x512xf32>
    %cst_119 = arith.constant dense<0.000000e+00> : vector<512xf32>
    %235 = vector.multi_reduction <add>, %234, %cst_119 [0] : vector<16x512xf32> to vector<512xf32>
    %236 = vector.shape_cast %235 : vector<512xf32> to vector<1x512xf32>
    %237 = vector.shape_cast %236 : vector<1x512xf32> to vector<4x128xf32>
    %238 = arith.addf %232, %237 : vector<4x128xf32>
    %c1_120 = arith.constant 1 : index
    %c0_121 = arith.constant 0 : index
    %c0_122 = arith.constant 0 : index
    %239 = vector.load %arg4[%c1_120, %c0_121, %c0_122] : memref<2x8x128xf32, #tpu.memory_space<vmem>>, vector<1x4x128xf32>
    %240 = vector.shape_cast %239 : vector<1x4x128xf32> to vector<4x128xf32>
    %241 = vector.shape_cast %238 : vector<4x128xf32> to vector<1x4x128xf32>
    tpu.vector_store %arg4[%c1_120, %c0_121, %c0_122], %241 {strides = array<i32>} : memref<2x8x128xf32, #tpu.memory_space<vmem>>, vector<1x4x128xf32>,
    %242 = vector.extract_strided_slice %132 {offsets = [16, 0], sizes = [16, 128], strides = [1, 1]} : vector<32x128xf32> to vector<16x128xf32>
    %cst_123 = arith.constant dense<0.000000e+00> : vector<4x128xf32>
    %243 = tpu.matmul %147, %242, %cst_123 {dimension_numbers = #tpu.dot_dimension_numbers<[1], [0], [0], [1], [0, 0, 1, 1], [], []>} : vector<4x16xf32>, vector<16x128xf32>, vector<4x128xf32> -> vector<4x128xf32>
    %244 = tpu.concatenate %242, %242, %242, %242 in 1 : vector<16x128xf32>, vector<16x128xf32>, vector<16x128xf32>, vector<16x128xf32> -> vector<16x512xf32>
    %245 = arith.mulf %244, %230 : vector<16x512xf32>
    %cst_124 = arith.constant dense<0.000000e+00> : vector<512xf32>
    %246 = vector.multi_reduction <add>, %245, %cst_124 [0] : vector<16x512xf32> to vector<512xf32>
    %247 = vector.shape_cast %246 : vector<512xf32> to vector<1x512xf32>
    %248 = vector.shape_cast %247 : vector<1x512xf32> to vector<4x128xf32>
    %249 = arith.addf %243, %248 : vector<4x128xf32>
    %c1_125 = arith.constant 1 : index
    %c4_126 = arith.constant 4 : index
    %c0_127 = arith.constant 0 : index
    %250 = vector.load %arg4[%c1_125, %c4_126, %c0_127] : memref<2x8x128xf32, #tpu.memory_space<vmem>>, vector<1x4x128xf32>
    %251 = vector.shape_cast %250 : vector<1x4x128xf32> to vector<4x128xf32>
    %252 = vector.shape_cast %249 : vector<4x128xf32> to vector<1x4x128xf32>
    tpu.vector_store %arg4[%c1_125, %c4_126, %c0_127], %252 {strides = array<i32>} : memref<2x8x128xf32, #tpu.memory_space<vmem>>, vector<1x4x128xf32>,
    return
  }
  func.func @transform_0(%arg0: i32) -> (i32, i32, i32) {
    %c0_i32 = arith.constant 0 : i32
    %c0_i32_0 = arith.constant 0 : i32
    %c0_i32_1 = arith.constant 0 : i32
    return %arg0, %c0_i32, %c0_i32_0 : i32, i32, i32
  }
  func.func @transform_1(%arg0: i32) -> (i32, i32) {
    %c0_i32 = arith.constant 0 : i32
    %c0_i32_0 = arith.constant 0 : i32
    %c0_i32_1 = arith.constant 0 : i32
    return %c0_i32, %c0_i32_0 : i32, i32
  }
  func.func @transform_2(%arg0: i32) -> (i32, i32) {
    %c0_i32 = arith.constant 0 : i32
    %c0_i32_0 = arith.constant 0 : i32
    %c0_i32_1 = arith.constant 0 : i32
    return %c0_i32, %c0_i32_0 : i32, i32
  }
  func.func @transform_3(%arg0: i32) -> (i32, i32, i32) {
    %c0_i32 = arith.constant 0 : i32
    %c0_i32_0 = arith.constant 0 : i32
    %c0_i32_1 = arith.constant 0 : i32
    return %arg0, %c0_i32, %c0_i32_0 : i32, i32, i32
  }
}

</mosaic_0001>

<bundles_post_ra>
// kernel: tpu_custom_call.1
= control target key start
LH: loop header
LB: loop body
LE: loop exit
PB: predicated region body
PF: predicated region fallthrough
CT: control target
= control target key end

     0   :  { %vm39_vm0 = vcmask 64512   ;;  %s3956_s0 = inlined_call_operand.vmem [shape: f32[2,8,128], index: 0, kind: input, shape index: {}]   ;;  %s3957_s1 = inlined_call_operand.vmem [shape: f32[112,8], index: 1, kind: input, shape index: {}]   ;;  %s3958_s2 = inlined_call_operand.vmem [shape: f32[16,28], index: 2, kind: input, shape index: {}]   ;;  %s3959_s3 = inlined_call_operand.hbm [shape: f32[2,8,128], index: 3, kind: output, shape index: {}]  }
   0x1   :  { %v38_v0 = vld [vmem:[%s3956_s0] sm:$0xff]  ;;  %v2946_v2 = vld [vmem:[%s3957_s1 + $0x8] sm:$0xff]  ;;  %v2953_v3 = vld [vmem:[%s3957_s1 + $0x10] sm:$0xff] }
   0x2   :  { %v2941_v1 = vld [vmem:[%s3957_s1] sm:$0xff]  ;;  %2649 = vmatprep.subr.mxu0 %v38_v0  ;;  %v2962_v4 = vld [vmem:[%s3957_s1 + $0x18] sm:$0xff] }
   0x3   :  { %2651 = vmatprep.mubr.msk.f32.mxu0 %vm39_vm0, %v2941_v1  ;;  %2650 = vmatpush3.msra.mxu0 %v38_v0  ;;  %v2967_v5 = vld [vmem:[%s3957_s1 + $0x20] sm:$0xff] }
   0x4   :  { %2652 = vmatmul.mubr.msk.f32.vlgmr.msra.gmra.mrb[0].mxu0 %vm39_vm0, %v2946_v2 }
   0x5   :  { %2654 = vmatprep.mubr.msk.f32.mxu0 %vm39_vm0, %v2953_v3 }
   0x6   :  { %8 = vsyncpa [#allocation4], 0  ;;  %v2976_v6 = vld [vmem:[%s3957_s1 + $0x28] sm:$0xff]  ;;  %v2981_v7 = vld [vmem:[%s3957_s1 + $0x30] sm:$0xff]  ;;  %v15_v25 = vlaneseq  ;;  %v2899_v26 = vmov 1935823168  }
   0x7   :  { %v2990_v8 = vld [vmem:[%s3957_s1 + $0x38] sm:$0xff]  ;;  %v2995_v9 = vld [vmem:[%s3957_s1 + $0x40] sm:$0xff]  ;;  %v3004_v10 = vld [vmem:[%s3957_s1 + $0x48] sm:$0xff]  ;;  %v290_v27 = vunpack.c.l.s4 %v2899_v26  ;;  %v2900_v32 = vmov 1983009808   ;;  %s2902_s15 = smov 2  }
   0x8   :  { %2655 = vmatmul.mubr.msk.f32.gmra.mrb[2].mxu0 %vm39_vm0, %v2962_v4  ;;  %v3009_v11 = vld [vmem:[%s3957_s1 + $0x50] sm:$0xff]  ;;  %v3018_v12 = vld [vmem:[%s3957_s1 + $0x58] sm:$0xff]  ;;  %v3023_v13 = vld [vmem:[%s3957_s1 + $0x60] sm:$0xff]  ;;  %v3061_v31 = vshrl.u32 %v15_v25, 7  ;;  %v364_v33 = vunpack.c.l.s4 %v2900_v32  ;;  %s2903_s16 = smov 1   ;;  %s2904_s17 = smov 127  }
   0x9   :  { %2657 = vmatprep.mubr.msk.f32.mxu0 %vm39_vm0, %v2967_v5  ;;  %v3032_v14 = vld [vmem:[%s3957_s1 + $0x68] sm:$0xff]  ;;  %v291_v30 = vunpack.c.0.s8 %v290_v27  ;;  %s2901_s1 = smov 3   ;;  %s2905_s18 = smov 125   ;;  %v3961_v51 = vmov 0.0   ;;  %v3140_v52 = vand.u32 127, %v15_v25 }
   0xa   :  { %4000 = vst [vmem:[#allocation8_spill] sm:$0xff] %v3061_v31  ;;  %v365_v37 = vunpack.c.0.s8 %v364_v33  ;;  %s2906_s19 = smov 126  }
   0xb   :  { %v3068_v36 = vsub.s32 %v291_v30, %v3061_v31  ;;  %v19_v53 = vadd.s32 384, %v3140_v52  ;;  %v18_v57 = vadd.s32 256, %v3140_v52  ;;  %vm656_vm1 = vcmp.lt.s32.totalorder %v3140_v52, 2 }
   0xc   :  { %2658 = vmatmul.mubr.msk.f32.gmra.mrb[4].mxu0 %vm39_vm0, %v2976_v6  ;;  %v3073_v42 = vsub.s32 %v365_v37, %v3061_v31  ;;  %vm619_vm3 = vcmp.lt.s32.totalorder %v3140_v52, 3  ;;  %vm705_vm6 = vcmp.lt.s32.totalorder %v3140_v52, 1  ;;  %vm750_vm10 = vcmp.lt.s32.totalorder %v3140_v52, 127 }
   0xd   :  { %2660 = vmatprep.mubr.msk.f32.mxu0 %vm39_vm0, %v2981_v7  ;;  %v23_v56 = vand.u32 127, %v19_v53  ;;  %v22_v61 = vand.u32 127, %v18_v57  ;;  %vm787_vm12 = vcmp.lt.s32.totalorder %v3140_v52, 126  ;;  %vm836_vm13 = vcmp.lt.s32.totalorder %v3140_v52, 125 }
   0xf   :  { %v3146_v60 = vadd.s32 4294967294, %v23_v56  ;;  %v3153_v0 = vadd.s32 4294967293, %v23_v56  ;;  %v3156_v25 = vadd.s32 4294967294, %v22_v61  ;;  %v3170_v37 = vadd.s32 4294967295, %v23_v56 }
  0x10   :  { %2661 = vmatmul.mubr.msk.f32.gmra.mrb[6].mxu0 %vm39_vm0, %v2990_v8  ;;  %v3193_v57 = vadd.s32 1, %v23_v56  ;;  %v3232_v20 = vadd.s32 1, %v22_v61 }
  0x11   :  { %2663 = vmatprep.mubr.msk.f32.mxu0 %vm39_vm0, %v2995_v9  ;;  %4001 = vst [vmem:[#allocation9_spill] sm:$0xff] %v3153_v0  ;;  %vm668_vm2 = vcmp.ge.s32.totalorder %v3146_v60, 0  ;;  %vm3985_vm4 = vcmp.ge.s32.totalorder %v3153_v0, 0  ;;  %vm667_vm5 = vcmp.ge.s32.totalorder %v3156_v25, 0  ;;  %4002 = vst [vmem:[#allocation10_spill] sm:$0xff] %v3170_v37  ;;  %vm3960_vm7 = vcmp.ge.s32.totalorder %v3170_v37, 0 }
  0x12   :  { %4005 = vst [vmem:[#allocation13_spill] sm:$0xff] %v3193_v57  ;;  %vm3964_vm11 = vcmp.lt.s32.totalorder %v3193_v57, 128  ;;  %4009 = vst [vmem:[#allocation17_spill] sm:$0xff] %v3232_v20 }
  0x14   :  { %2664 = vmatmul.mubr.msk.f32.gmra.mrb[8].mxu0 %vm39_vm0, %v3004_v10 }
  0x15   :  { %2666 = vmatprep.mubr.msk.f32.mxu0 %vm39_vm0, %v3009_v11 }
  0x18   :  { %2667 = vmatmul.mubr.msk.f32.gmra.mrb[10].mxu0 %vm39_vm0, %v3018_v12 }
  0x19   :  { %2669 = vmatprep.mubr.msk.f32.mxu0 %vm39_vm0, %v3023_v13 }
  0x1c   :  { %2670 = vmatmul.mubr.msk.f32.gmra.mrb[12].mxu0 %vm39_vm0, %v3032_v14 }
  0x1d   :  { %1044 = vmatprep.mubr.f32.mxu0 %v3961_v51 }
  0xd7   :  { %v3036_v15 = vpop.f32.mrb[0].mxu0 }
  0xd8   :  { %v3038_v16 = vpop.f32.mrb[1].mxu0 }
  0xdb   :  { %v3042_v18 = vpop.f32.mrb[2].mxu0 }
  0xdc   :  { %3998 = vst [vmem:[#allocation6_spill] sm:$0xff] %v3042_v18  ;;  %v3044_v19 = vpop.f32.mrb[3].mxu0 }
  0xdd   :  { %3999 = vst [vmem:[#allocation7_spill] sm:$0xff] %v3044_v19 }
  0xdf   :  { %v3048_v21 = vpop.f32.mrb[4].mxu0 }
  0xe0   :  { %v3050_v22 = vpop.f32.mrb[5].mxu0 }
  0xe3   :  { %v3052_v23 = vpop.f32.mrb[6].mxu0 }
  0xe4   :  { %v3054_v24 = vpop.f32.mrb[7].mxu0 }
  0xe7   :  { %v3056_v28 = vpop.f32.mrb[8].mxu0 }
  0xe8   :  { %v3058_v29 = vpop.f32.mrb[9].mxu0 }
  0xeb   :  { %v3063_v34 = vpop.f32.mrb[10].mxu0 }
  0xec   :  { %v3065_v35 = vpop.f32.mrb[11].mxu0 }
  0xef   :  { %v2671_v38 = vpop.f32.mrb[12].mxu0 }
  0xf0   :  { %v358_v39 = vrot.slane %v2671_v38, %v3068_v36  ;;  %v208_v40 = vpop.f32.mrb[13].mxu0  ;;  %v3172_v38 = vadd.s32 4294967293, %v22_v61 }
  0xf1   :  { %v351_v41 = vrot.slane %v208_v40, %v3068_v36 }
  0xf2   :  { %4003 = vst [vmem:[#allocation11_spill] sm:$0xff] %v3172_v38  ;;  %vm630_vm8 = vcmp.ge.s32.totalorder %v3172_v38, 0 }
  0xf3   :  { %v361_v43 = vcombine.low %v351_v41, %v358_v39  ;;  %v362_v44 = vcombine.high %v351_v41, %v358_v39 }
  0xf5   :  { %v3076_v45 = vrot.slane %v361_v43, %v3073_v42  ;;  %v3079_v46 = vrot.slane %v362_v44, %v3073_v42  ;;  %2568 = vst.sshfl [vmem:[#allocation2 + $0x28] sm:$0xcc pattern:$0x76325410] %v361_v43 }
  0xf6   :  { %2569 = vst.sshfl [vmem:[#allocation2 + $0x38] sm:$0xcc pattern:$0x76325410] %v362_v44 }
  0xf7   :  { %615 = vrot.lane.b32.xlu1 %v3079_v46, %s2901_s1  ;;  %652 = vrot.lane.b32.xlu0 %v3079_v46, %s2902_s15  ;;  %v3087_v47 = vcombine.high %v3076_v45, %v3076_v45  ;;  %v735_v48 = vcombine.low %v3079_v46, %v3079_v46  ;;  %v734_v49 = vcombine.low %v3076_v45, %v3076_v45 }
  0xf8   :  { %v3104_v50 = vcombine.high %v3079_v46, %v3079_v46 }
  0xf9   :  { %535 = vmatprep.mubr.f32.mxu1 %v3087_v47  ;;  %740 = vst [vmem:[#allocation2 + $0x30] sm:$0xf0] %v735_v48  ;;  %738 = vst [vmem:[#allocation2 + $0x20] sm:$0xf0] %v734_v49  ;;  %v3189_v49 = vadd.s32 4294967295, %v22_v61 }
  0xfb   :  { %701 = vrot.lane.b32.xlu1 %v3079_v46, %s2903_s16  ;;  %742 = vrot.lane.b32.xlu0 %v3076_v45, %s2904_s17  ;;  %4004 = vst [vmem:[#allocation12_spill] sm:$0xff] %v3189_v49  ;;  %vm3969_vm9 = vcmp.ge.s32.totalorder %v3189_v49, 0 }
  0xff   :  { %828 = vrot.lane.b32.xlu0 %v3076_v45, %s2905_s18  ;;  %779 = vrot.lane.b32.xlu1 %v3076_v45, %s2906_s19 }
 0x103   :  { %654 = vrot.lane.b32.xlu0 %v3104_v50, %s2902_s15  ;;  %783 = vrot.lane.b32.xlu1 %v3079_v46, %s2906_s19 }
 0x107   :  { %617 = vrot.lane.b32.xlu0 %v3104_v50, %s2901_s1  ;;  %650 = vrot.lane.b32.xlu1 %v3087_v47, %s2902_s15 }
 0x10b   :  { %703 = vrot.lane.b32.xlu0 %v3104_v50, %s2903_s16  ;;  %613 = vrot.lane.b32.xlu1 %v3087_v47, %s2901_s1 }
 0x10f   :  { %699 = vrot.lane.b32.xlu0 %v3087_v47, %s2903_s16  ;;  %748 = vrot.lane.b32.xlu1 %v3104_v50, %s2904_s17 }
 0x113   :  { %785 = vrot.lane.b32.xlu0 %v3104_v50, %s2906_s19  ;;  %834 = vrot.lane.b32.xlu1 %v3104_v50, %s2905_s18 }
 0x117   :  { %746 = vrot.lane.b32.xlu0 %v3079_v46, %s2904_s17  ;;  %832 = vrot.lane.b32.xlu1 %v3079_v46, %s2905_s18 }
 0x136   :  { %217 = vmax.xlane.f32.xlu0 %v3050_v22 }
 0x13a   :  { %221 = vmax.xlane.f32.xlu0 %v3054_v24 }
 0x13b   :  { %219 = vmax.xlane.f32.xlu1 %v3048_v21 }
 0x13e   :  { %223 = vmax.xlane.f32.xlu0 %v3052_v23 }
 0x13f   :  { %225 = vmax.xlane.f32.xlu1 %v3058_v29 }
 0x142   :  { %227 = vmax.xlane.f32.xlu0 %v3056_v28 }
 0x143   :  { %229 = vmax.xlane.f32.xlu1 %v3065_v35 }
 0x146   :  { %231 = vmax.xlane.f32.xlu0 %v3063_v34 }
 0x169   :  { %v616_v54 = vpop.permute.xlu1 %615  ;;  %v653_v55 = vpop.permute.xlu0 %652 }
 0x16d   :  { %v702_v58 = vpop.permute.xlu1 %701  ;;  %v3144_v59 = vpop.permute.xlu0 %742 }
 0x171   :  { %v3148_v62 = vpop.permute.xlu0 %828  ;;  %v3150_v63 = vpop.permute.xlu1 %779 }
 0x175   :  { %v3158_v26 = vpop.permute.xlu0 %654  ;;  %v3160_v27 = vpop.permute.xlu1 %783 }
 0x176   :  { %v657_v30 = vsel %vm656_vm1, %v653_v55, %v3158_v26 }
 0x177   :  { %v680_v32 = vsel %vm668_vm2, %v657_v30, 0.0 }
 0x178   :  { %v688_v33 = vrot.slane %v680_v32, 4 }
 0x179   :  { %v3174_v39 = vpop.permute.xlu0 %617  ;;  %v3176_v40 = vpop.permute.xlu1 %650 }
 0x17a   :  { %696 = vst [vmem:[#allocation2 + $0x18] sm:$0xf0] %v688_v33  ;;  %v620_v41 = vsel %vm619_vm3, %v616_v54, %v3174_v39  ;;  %v658_v43 = vsel %vm656_vm1, %v3176_v40, %v653_v55 }
 0x17b   :  { %v643_v44 = vsel %vm3985_vm4, %v620_v41, 0.0  ;;  %v679_v48 = vsel %vm667_vm5, %v658_v43, 0.0 }
 0x17c   :  { %647 = vst [vmem:[#allocation2 + $0x18] sm:$0xf] %v643_v44  ;;  %v687_v53 = vrot.slane %v679_v48, 4  ;;  %v3212_v44 = vadd.s32 2, %v22_v61  ;;  %v3214_v48 = vadd.s32 2, %v23_v56 }
 0x17d   :  { %v3195_v30 = vpop.permute.xlu0 %703  ;;  %v3197_v55 = vpop.permute.xlu1 %613 }
 0x17e   :  { %695 = vst [vmem:[#allocation2 + $0x10] sm:$0xf0] %v687_v53  ;;  %v706_v32 = vsel %vm705_vm6, %v702_v58, %v3195_v30  ;;  %v621_v33 = vsel %vm619_vm3, %v3197_v55, %v616_v54  ;;  %4006 = vst [vmem:[#allocation14_spill] sm:$0xff] %v3212_v44  ;;  %v3216_v53 = vadd.s32 3, %v23_v56  ;;  %vm3974_vm14 = vcmp.lt.s32.totalorder %v3212_v44, 128 }
 0x17f   :  { %v729_v41 = vsel %vm3960_vm7, %v706_v32, 0.0  ;;  %v642_v43 = vsel %vm630_vm8, %v621_v33, 0.0  ;;  %4007 = vst [vmem:[#allocation15_spill] sm:$0xff] %v3214_v48  ;;  %vm3973_vm15 = vcmp.lt.s32.totalorder %v3214_v48, 128 }
 0x180   :  { %733 = vst [vmem:[#allocation2 + $0x38] sm:$0xf] %v729_v41  ;;  %646 = vst [vmem:[#allocation2 + $0x10] sm:$0xf] %v642_v43  ;;  %vm3972_vm7 = vcmp.lt.s32.totalorder %v3216_v53, 128 }
 0x181   :  { %4008 = vst [vmem:[#allocation16_spill] sm:$0xff] %v3216_v53  ;;  %v3218_v54 = vpop.permute.xlu0 %699  ;;  %v749_v32 = vpop.permute.xlu1 %748 }
 0x182   :  { %v707_v33 = vsel %vm705_vm6, %v3218_v54, %v702_v58  ;;  %v754_v41 = vsel %vm750_vm10, %v749_v32, %v3144_v59  ;;  %v3237_v58 = vadd.s32 3, %v22_v61 }
 0x183   :  { %v728_v43 = vsel %vm3969_vm9, %v707_v33, 0.0  ;;  %v774_v56 = vsel %vm3964_vm11, %v754_v41, 0.0  ;;  %vm3984_vm11 = vcmp.lt.s32.totalorder %v3232_v20, 128  ;;  %v870_v57 = vld [vmem:[#allocation2 + $0x18] sm:$0xff] }
 0x184   :  { %732 = vst [vmem:[#allocation2 + $0x30] sm:$0xf] %v728_v43  ;;  %778 = vst [vmem:[#allocation2 + $0x58] sm:$0xf] %v774_v56  ;;  %vm3983_vm9 = vcmp.lt.s32.totalorder %v3237_v58, 128 }
 0x185   :  { %4010 = vst [vmem:[#allocation18_spill] sm:$0xff] %v3237_v58  ;;  %v786_v17 = vpop.permute.xlu0 %785  ;;  %v835_v51 = vpop.permute.xlu1 %834 }
 0x186   :  { %v788_v33 = vsel %vm787_vm12, %v3160_v27, %v786_v17  ;;  %v791_v41 = vsel %vm787_vm12, %v786_v17, %v3150_v63  ;;  %v840_v43 = vsel %vm836_vm13, %v835_v51, %v3148_v62 }
 0x187   :  { %v810_v56 = vsel %vm3974_vm14, %v788_v33, 0.0  ;;  %v811_v61 = vsel %vm3973_vm15, %v791_v41, 0.0  ;;  %v860_v31 = vsel %vm3972_vm7, %v840_v43, 0.0  ;;  %v874_v37 = vld [vmem:[#allocation2 + $0x38] sm:$0xff]  ;;  %vm890_vm7 = vcmask 1043456  }
 0x188   :  { %v818_v49 = vrot.slane %v810_v56, 4  ;;  %v819_v0 = vrot.slane %v811_v61, 4  ;;  %864 = vst [vmem:[#allocation2 + $0x78] sm:$0xf] %v860_v31  ;;  %v2741_v17 = vpack.c.bf16 %v874_v37, %v870_v57  ;;  %v869_v57 = vld [vmem:[#allocation2 + $0x10] sm:$0xff]  ;;  %vm2908_vm15 = vmmov 1  }
 0x189   :  { %v3256_v38 = vpop.permute.xlu0 %746  ;;  %v3258_v44 = vpop.permute.xlu1 %832  ;;  %vm3270_vm14 = vmpackc.low %vm890_vm7, %vm2908_vm15  ;;  %vm883_vm7 = vcmask 228352  }
 0x18a   :  { %826 = vst [vmem:[#allocation2 + $0x50] sm:$0xf0] %v818_v49  ;;  %827 = vst [vmem:[#allocation2 + $0x58] sm:$0xf0] %v819_v0  ;;  %v751_v33 = vsel %vm750_vm10, %v3256_v38, %v749_v32  ;;  %v837_v41 = vsel %vm836_vm13, %v3258_v44, %v835_v51  ;;  %2742 = vmatprep.subr.bf16.mxu0 %v2741_v17 }
 0x18b   :  { %v773_v31 = vsel %vm3984_vm11, %v751_v33, 0.0  ;;  %v859_v37 = vsel %vm3983_vm9, %v837_v41, 0.0  ;;  %v873_v43 = vld [vmem:[#allocation2 + $0x30] sm:$0xff]  ;;  %v2580_v41 = vld [vmem:[%s3956_s0 + $0x8] sm:$0xff] }
 0x18c   :  { %777 = vst [vmem:[#allocation2 + $0x50] sm:$0xf] %v773_v31  ;;  %863 = vst [vmem:[#allocation2 + $0x70] sm:$0xf] %v859_v37  ;;  %v2743_v0 = vpack.c.bf16 %v873_v43, %v869_v57  ;;  %v3284_v31 = vld [vmem:[%s3958_s2] sm:$0xff]  ;;  %v4013_v37 = vmov 0.0  }
 0x18d   :  { %v3292_v57 = vld [vmem:[%s3958_s2 + $0x8] sm:$0xff] }
 0x18e   :  { %2744 = vmatpush1.bf16.msra.mxu0 %v2743_v0 }
 0x18f   :  { %v882_v32 = vld [vmem:[#allocation2 + $0x78] sm:$0xf] }
 0x191   :  { %v878_v49 = vld [vmem:[#allocation2 + $0x58] sm:$0xff] }
 0x192   :  { %v2745_v51 = vpack.c.bf16 %v882_v32, %v878_v49 }
 0x193   :  { %v877_v61 = vld [vmem:[#allocation2 + $0x50] sm:$0xff] }
 0x194   :  { %v881_v17 = vld [vmem:[#allocation2 + $0x70] sm:$0xf]  ;;  %2747 = vmatprep.subr.msk.bf16.mxu0 %vm3270_vm14, %v2745_v51 }
 0x195   :  { %v2748_v33 = vpack.c.bf16 %v881_v17, %v877_v61 }
 0x197   :  { %2750 = vmatpush1.bf16.msk.msra.mxu0 %vm3270_vm14, %v2748_v33 }
 0x198   :  { %2686 = vmatprep.subr.mxu0 %v2580_v41 }
 0x19a   :  { %2576 = vmatmul.mubr.msk.f32.vlgmr.msra.gmra.mrb[14].mxu0 %vm883_vm7, %v3284_v31 }
 0x19b   :  { %1050 = vmatprep.mubr.f32.mxu0 %v4013_v37  ;;  %2687 = vmatpush3.msra.mxu0 %v2580_v41 }
 0x19e   :  { %2577 = vmatmul.mubr.msk.f32.gmra.mrb[16].mxu0 %vm883_vm7, %v3292_v57 }
 0x19f   :  { %2688 = vmatprep.mubr.msk.f32.mxu0 %vm39_vm0, %v2941_v1 }
 0x1a2   :  { %2689 = vmatmul.mubr.msk.f32.vlgmr.msra.gmra.mrb[18].mxu0 %vm39_vm0, %v2946_v2 }
 0x1a3   :  { %2691 = vmatprep.mubr.msk.f32.mxu0 %vm39_vm0, %v2953_v3 }
 0x1a6   :  { %2692 = vmatmul.mubr.msk.f32.gmra.mrb[20].mxu0 %vm39_vm0, %v2962_v4 }
 0x1a7   :  { %2694 = vmatprep.mubr.msk.f32.mxu0 %vm39_vm0, %v2967_v5 }
 0x1aa   :  { %2695 = vmatmul.mubr.msk.f32.gmra.mrb[22].mxu0 %vm39_vm0, %v2976_v6 }
 0x1ab   :  { %2697 = vmatprep.mubr.msk.f32.mxu0 %vm39_vm0, %v2981_v7 }
 0x1ae   :  { %2698 = vmatmul.mubr.msk.f32.gmra.mrb[24].mxu0 %vm39_vm0, %v2990_v8 }
 0x1af   :  { %2700 = vmatprep.mubr.msk.f32.mxu0 %vm39_vm0, %v2995_v9 }
 0x1b2   :  { %2701 = vmatmul.mubr.msk.f32.gmra.mrb[26].mxu0 %vm39_vm0, %v3004_v10 }
 0x1b3   :  { %2703 = vmatprep.mubr.msk.f32.mxu0 %vm39_vm0, %v3009_v11 }
 0x1b6   :  { %2704 = vmatmul.mubr.msk.f32.gmra.mrb[28].mxu0 %vm39_vm0, %v3018_v12 }
 0x1b7   :  { %2706 = vmatprep.mubr.msk.f32.mxu0 %vm39_vm0, %v3023_v13 }
 0x1ba   :  { %2707 = vmatmul.mubr.msk.f32.gmra.mrb[30].mxu0 %vm39_vm0, %v3032_v14 }
 0x1bb   :  { %2249 = vmatprep.mubr.f32.mxu0 %v4013_v37 }
 0x1c3   :  { %v218_v1 = vpop.xlane.xlu0 %217 }
 0x1c4   :  { %v233_v2 = vsub.f32 %v3050_v22, %v218_v1 }
 0x1c6   :  { %v241_v3 = vmul.f32 1.442695, %v233_v2 }
 0x1c7   :  { %v222_v4 = vpop.xlane.xlu0 %221 }
 0x1c8   :  { %2811 = vpow2.f32 %v241_v3  ;;  %v235_v5 = vsub.f32 %v3054_v24, %v222_v4  ;;  %v220_v6 = vpop.xlane.xlu1 %219 }
 0x1c9   :  { %v234_v7 = vsub.f32 %v3048_v21, %v220_v6 }
 0x1ca   :  { %v245_v8 = vmul.f32 1.442695, %v235_v5 }
 0x1cb   :  { %v243_v9 = vmul.f32 1.442695, %v234_v7  ;;  %v224_v10 = vpop.xlane.xlu0 %223 }
 0x1cc   :  { %2813 = vpow2.f32 %v245_v8  ;;  %v236_v11 = vsub.f32 %v3052_v23, %v224_v10  ;;  %v226_v12 = vpop.xlane.xlu1 %225 }
 0x1cd   :  { %2815 = vpow2.f32 %v243_v9  ;;  %v237_v13 = vsub.f32 %v3058_v29, %v226_v12 }
 0x1ce   :  { %v247_v14 = vmul.f32 1.442695, %v236_v11 }
 0x1cf   :  { %v249_v22 = vmul.f32 1.442695, %v237_v13  ;;  %v228_v43 = vpop.xlane.xlu0 %227 }
 0x1d0   :  { %2817 = vpow2.f32 %v247_v14  ;;  %v238_v0 = vsub.f32 %v3056_v28, %v228_v43  ;;  %v230_v24 = vpop.xlane.xlu1 %229 }
 0x1d1   :  { %2819 = vpow2.f32 %v249_v22  ;;  %v239_v21 = vsub.f32 %v3065_v35, %v230_v24 }
 0x1d2   :  { %v2812_v49 = vpop.eup %2811  ;;  %v251_v32 = vmul.f32 1.442695, %v238_v0 }
 0x1d3   :  { %v253_v51 = vmul.f32 1.442695, %v239_v21  ;;  %v232_v61 = vpop.xlane.xlu0 %231  ;;  %257 = vadd.xlane.f32.xlu1 %v2812_v49 }
 0x1d4   :  { %2821 = vpow2.f32 %v251_v32  ;;  %v240_v23 = vsub.f32 %v3063_v34, %v232_v61 }
 0x1d5   :  { %2823 = vpow2.f32 %v253_v51 }
 0x1d6   :  { %v2814_v29 = vpop.eup %2813  ;;  %v255_v17 = vmul.f32 1.442695, %v240_v23 }
 0x1d7   :  { %v2816_v33 = vpop.eup %2815  ;;  %261 = vadd.xlane.f32.xlu1 %v2814_v29 }
 0x1d8   :  { %2825 = vpow2.f32 %v255_v17  ;;  %259 = vadd.xlane.f32.xlu0 %v2816_v33 }
 0x1da   :  { %v2818_v28 = vpop.eup %2817 }
 0x1db   :  { %v3333_v41 = vpop.eup %2819 }
 0x1dc   :  { %263 = vadd.xlane.f32.xlu0 %v2818_v28  ;;  %265 = vadd.xlane.f32.xlu1 %v3333_v41 }
 0x1de   :  { %v3336_v35 = vpop.eup %2821 }
 0x1df   :  { %v3338_v1 = vpop.eup %2823 }
 0x1e0   :  { %267 = vadd.xlane.f32.xlu0 %v3336_v35  ;;  %269 = vadd.xlane.f32.xlu1 %v3338_v1 }
 0x1e2   :  { %v3342_v34 = vpop.eup %2825 }
 0x1e4   :  { %271 = vadd.xlane.f32.xlu0 %v3342_v34 }
 0x260   :  { %v258_v2 = vpop.xlane.xlu1 %257 }
 0x264   :  { %v262_v3 = vpop.xlane.xlu1 %261 }
 0x265   :  { %v260_v4 = vpop.xlane.xlu0 %259 }
 0x266   :  { %2827 = vrcp.f32 %v260_v4 }
 0x267   :  { %2829 = vrcp.f32 %v258_v2 }
 0x268   :  { %2831 = vrcp.f32 %v262_v3 }
 0x269   :  { %v264_v5 = vpop.xlane.xlu0 %263  ;;  %v266_v6 = vpop.xlane.xlu1 %265 }
 0x26a   :  { %2833 = vrcp.f32 %v264_v5 }
 0x26b   :  { %2835 = vrcp.f32 %v266_v6 }
 0x26d   :  { %v1046_v7 = vpop.f32.mrb[14].mxu0  ;;  %v268_v10 = vpop.xlane.xlu0 %267 }
 0x26e   :  { %v1059_v8 = vmul.f32 %v1046_v7, %v3038_v16  ;;  %v1199_v9 = vmul.f32 %v1046_v7, %v3044_v19  ;;  %v270_v11 = vpop.xlane.xlu1 %269  ;;  %2837 = vrcp.f32 %v268_v10  ;;  %v1048_v12 = vpop.f32.mrb[15].mxu0 }
 0x26f   :  { %2839 = vrcp.f32 %v270_v11  ;;  %v1060_v13 = vmul.f32 %v1048_v12, %v3038_v16  ;;  %v1200_v14 = vmul.f32 %v1048_v12, %v3044_v19 }
 0x270   :  { %v2828_v22 = vpop.eup %2827 }
 0x271   :  { %v1052_v43 = vpop.f32.mrb[16].mxu0  ;;  %v2830_v0 = vpop.eup %2829  ;;  %v282_v4 = vmul.f32 %v2828_v22, %v2816_v33 }
 0x272   :  { %v1063_v24 = vmul.f32 %v3036_v15, %v1052_v43  ;;  %v1203_v21 = vmul.f32 %v3042_v18, %v1052_v43  ;;  %v272_v32 = vpop.xlane.xlu0 %271  ;;  %v1054_v51 = vpop.f32.mrb[17].mxu0  ;;  %v281_v11 = vmul.f32 %v2830_v0, %v2812_v49 }
 0x273   :  { %2841 = vrcp.f32 %v272_v32  ;;  %v1064_v61 = vmul.f32 %v3036_v15, %v1054_v51  ;;  %v1204_v23 = vmul.f32 %v3042_v18, %v1054_v51  ;;  %v2832_v17 = vpop.eup %2831 }
 0x274   :  { %v1079_v2 = vadd.f32 %v1063_v24, %v1059_v8  ;;  %v1219_v3 = vadd.f32 %v1203_v21, %v1199_v9  ;;  %v2834_v5 = vpop.eup %2833  ;;  %v283_v19 = vmul.f32 %v2832_v17, %v2814_v29  ;;  %v3358_v8 = vrot.slane %v282_v4, %v3068_v36 }
 0x275   :  { %v1086_v6 = vadd.f32 %v1064_v61, %v1060_v13  ;;  %v1226_v7 = vadd.f32 %v1204_v23, %v1200_v14  ;;  %v3353_v10 = vpop.f32.mrb[18].mxu0  ;;  %v284_v58 = vmul.f32 %v2834_v5, %v2818_v28  ;;  %v2836_v32 = vpop.eup %2835  ;;  %v295_v49 = vrot.slane %v281_v11, %v3068_v36 }
 0x276   :  { %v1080_v12 = vrot.slane %v1079_v2, 4  ;;  %v1220_v53 = vrot.slane %v1219_v3, 4  ;;  %v3355_v43 = vpop.f32.mrb[19].mxu0  ;;  %v285_v29 = vmul.f32 %v2836_v32, %v3333_v41 }
 0x277   :  { %v1087_v20 = vrot.slane %v1086_v6, 4  ;;  %v1227_v48 = vrot.slane %v1226_v7, 4  ;;  %v316_v22 = vrot.slane %v284_v58, %v3068_v36  ;;  %v391_v58 = vcombine.low %v295_v49, %v3358_v8 }
 0x278   :  { %v1081_v51 = vadd.f32 %v1080_v12, %v1079_v2  ;;  %v1221_v18 = vadd.f32 %v1220_v53, %v1219_v3  ;;  %v2838_v33 = vpop.eup %2837 }
 0x279   :  { %v1088_v9 = vadd.f32 %v1087_v20, %v1086_v6  ;;  %v1228_v13 = vadd.f32 %v1227_v48, %v1226_v7  ;;  %v3360_v14 = vpop.f32.mrb[20].mxu0  ;;  %v2840_v0 = vpop.eup %2839  ;;  %v286_v53 = vmul.f32 %v2838_v33, %v3336_v35  ;;  %v309_v48 = vrot.slane %v283_v19, %v3068_v36 }
 0x27a   :  { %4014 = vst [vmem:[#allocation19_spill] sm:$0xff] %v3360_v14  ;;  %v1082_v28 = vrot.slane %v1081_v51, 2  ;;  %v1222_v24 = vrot.slane %v1221_v18, 2  ;;  %v3364_v21 = vpop.f32.mrb[21].mxu0  ;;  %v287_v20 = vmul.f32 %v2840_v0, %v3338_v1  ;;  %v392_v35 = vcombine.high %v295_v49, %v3358_v8 }
 0x27b   :  { %4015 = vst [vmem:[#allocation20_spill] sm:$0xff] %v3364_v21  ;;  %v1089_v61 = vrot.slane %v1088_v9, 2  ;;  %v1229_v23 = vrot.slane %v1228_v13, 2  ;;  %v330_v3 = vrot.slane %v286_v53, %v3068_v36  ;;  %v393_v41 = vcombine.low %v309_v48, %v316_v22 }
 0x27c   :  { %v1083_v17 = vadd.f32 %v1082_v28, %v1081_v51  ;;  %v1223_v2 = vadd.f32 %v1222_v24, %v1221_v18  ;;  %v323_v19 = vrot.slane %v285_v29, %v3068_v36  ;;  %v337_v33 = vrot.slane %v287_v20, %v3068_v36 }
 0x27d   :  { %v2842_v4 = vpop.eup %2841  ;;  %v1090_v5 = vadd.f32 %v1089_v61, %v1088_v9  ;;  %v1230_v6 = vadd.f32 %v1229_v23, %v1228_v13  ;;  %v3372_v7 = vpop.f32.mrb[22].mxu0  ;;  %v394_v9 = vcombine.high %v309_v48, %v316_v22  ;;  %v415_v29 = vrot.slane %v393_v41, %v3073_v42 }
 0x27e   :  { %v1084_v11 = vrot.slane %v1083_v17, 1  ;;  %v1224_v12 = vrot.slane %v1223_v2, 1  ;;  %1528 = vmax.xlane.f32.xlu0 %v3372_v7  ;;  %v3376_v1 = vpop.f32.mrb[23].mxu0  ;;  %v288_v18 = vmul.f32 %v2842_v4, %v3342_v34  ;;  %v427_v0 = vcombine.low %v323_v19, %v330_v3 }
 0x27f   :  { %v1091_v32 = vrot.slane %v1090_v5, 1  ;;  %v1231_v51 = vrot.slane %v1230_v6, 1  ;;  %1526 = vmax.xlane.f32.xlu1 %v3376_v1  ;;  %v428_v53 = vcombine.high %v323_v19, %v330_v3  ;;  %v401_v22 = vrot.slane %v391_v58, %v3073_v42 }
 0x280   :  { %v3382_v13 = vadd.f32 %v1084_v11, %v1083_v17  ;;  %v3384_v8 = vadd.f32 %v1224_v12, %v1223_v2  ;;  %v344_v49 = vrot.slane %v288_v18, %v3068_v36  ;;  %v422_v17 = vrot.slane %v394_v9, %v3073_v42 }
 0x281   :  { %v3387_v28 = vadd.f32 %v1091_v32, %v1090_v5  ;;  %v3389_v24 = vadd.f32 %v1231_v51, %v1230_v6  ;;  %v3391_v34 = vpop.f32.mrb[24].mxu0  ;;  %v437_v58 = vrot.slane %v427_v0, %v3073_v42  ;;  %v444_v6 = vrot.slane %v428_v53, %v3073_v42 }
 0x282   :  { %1532 = vmax.xlane.f32.xlu0 %v3391_v34  ;;  %v3395_v61 = vpop.f32.mrb[25].mxu0  ;;  %v429_v23 = vcombine.low %v337_v33, %v344_v49  ;;  %v430_v20 = vcombine.high %v337_v33, %v344_v49  ;;  %v424_v12 = vcombine.high %v401_v22, %v415_v29  ;;  %v408_v18 = vrot.slane %v392_v35, %v3073_v42 }
 0x283   :  { %4016 = vst [vmem:[#allocation21_spill] sm:$0xff] %v3389_v24  ;;  %1530 = vmax.xlane.f32.xlu1 %v3395_v61  ;;  %v423_v51 = vcombine.low %v401_v22, %v415_v29 }
 0x284   :  { %v451_v5 = vrot.slane %v429_v23, %v3073_v42  ;;  %v458_v41 = vrot.slane %v430_v20, %v3073_v42  ;;  %v426_v23 = vcombine.high %v408_v18, %v422_v17  ;;  %v425_v29 = vcombine.low %v408_v18, %v422_v17 }
 0x285   :  { %v3412_v11 = vpop.f32.mrb[26].mxu0 }
 0x286   :  { %1536 = vmax.xlane.f32.xlu0 %v3412_v11  ;;  %v1497_v19 = vpop.f32.mrb[27].mxu0  ;;  %v460_v32 = vcombine.high %v437_v58, %v451_v5  ;;  %v459_v33 = vcombine.low %v437_v58, %v451_v5  ;;  %v462_v9 = vcombine.high %v444_v6, %v458_v41  ;;  %v461_v35 = vcombine.low %v444_v6, %v458_v41 }
 0x287   :  { %1534 = vmax.xlane.f32.xlu1 %v1497_v19 }
 0x288   :  { %v2723_v49 = vpack.c.bf16 %v460_v32, %v424_v12  ;;  %v2725_v0 = vpack.c.bf16 %v459_v33, %v423_v51  ;;  %v2727_v20 = vpack.c.bf16 %v462_v9, %v426_v23  ;;  %v2729_v22 = vpack.c.bf16 %v461_v35, %v425_v29 }
 0x289   :  { %v3416_v4 = vpop.f32.mrb[28].mxu0 }
 0x28a   :  { %2724 = vmatprep.subr.bf16.mxu1 %v2723_v49  ;;  %1540 = vmax.xlane.f32.xlu0 %v3416_v4  ;;  %v3419_v53 = vpop.f32.mrb[29].mxu0 }
 0x28b   :  { %2726 = vmatpush1.bf16.xpose.msra.mxu1 %v2725_v0  ;;  %1538 = vmax.xlane.f32.xlu1 %v3419_v53 }
 0x28c   :  { %2728 = vmatprep.subr.bf16.mxu1 %v2727_v20 }
 0x28d   :  { %v2708_v17 = vpop.f32.mrb[30].mxu0 }
 0x28e   :  { %v1667_v58 = vrot.slane %v2708_v17, %v3068_v36  ;;  %v1517_v5 = vpop.f32.mrb[31].mxu0 }
 0x28f   :  { %v1660_v6 = vrot.slane %v1517_v5, %v3068_v36 }
 0x292   :  { %536 = vmatmul.mubr.f32.vlgmr.msra.gmra.mrb[0].mxu1 %v3076_v45 }
 0x293   :  { %2730 = vmatpush1.bf16.xpose.msra.mxu1 %v2729_v22  ;;  %605 = vmatprep.mubr.f32.mxu1 %v3104_v50  ;;  %v3434_v50 = vcombine.low %v1660_v6, %v1667_v58 }
 0x29a   :  { %606 = vmatmul.mubr.f32.vlgmr.msra.gmra.mrb[0].mxu1 %v3079_v46  ;;  %v3436_v46 = vcombine.high %v1660_v6, %v1667_v58 }
 0x29b   :  { %967 = vmatprep.mubr.f32.mxu1 %v4013_v37 }
 0x29c   :  { %648 = vrot.lane.b32.xlu1 %v3076_v45, %s2902_s15  ;;  %2596 = vst.sshfl [vmem:[#allocation2 + $0x38] sm:$0xcc pattern:$0x76325410] %v3436_v46 }
 0x2a0   :  { %611 = vrot.lane.b32.xlu0 %v3076_v45, %s2901_s1 }
 0x2a4   :  { %697 = vrot.lane.b32.xlu0 %v3076_v45, %s2903_s16  ;;  %v17_v45 = vadd.s32 128, %v3140_v52 }
 0x2a6   :  { %v3443_v23 = vand.u32 127, %v17_v45 }
 0x2a8   :  { %v3450_v17 = vadd.s32 4294967293, %v3443_v23  ;;  %v3458_v6 = vadd.s32 4294967294, %v3443_v23 }
 0x2aa   :  { %vm629_vm15 = vcmp.ge.s32.totalorder %v3450_v17, 0  ;;  %vm666_vm11 = vcmp.ge.s32.totalorder %v3458_v6, 0 }
 0x30b   :  { %v1529_v41 = vpop.xlane.xlu0 %1528 }
 0x30c   :  { %v1543_v12 = vsub.f32 %v3372_v7, %v1529_v41  ;;  %v1527_v18 = vpop.xlane.xlu1 %1526 }
 0x30d   :  { %v1542_v32 = vsub.f32 %v3376_v1, %v1527_v18  ;;  %v3447_v1 = vadd.s32 4294967293, %v3140_v52  ;;  %v3468_v18 = vadd.s32 4294967295, %v3140_v52 }
 0x30e   :  { %v1552_v51 = vmul.f32 1.442695, %v1543_v12 }
 0x30f   :  { %v1533_v33 = vpop.xlane.xlu0 %1532  ;;  %v1550_v9 = vmul.f32 1.442695, %v1542_v32  ;;  %vm3986_vm0 = vcmp.ge.s32.totalorder %v3447_v1, 0  ;;  %v3471_v32 = vadd.s32 4294967295, %v3443_v23  ;;  %vm3987_vm4 = vcmp.ge.s32.totalorder %v3468_v18, 0 }
 0x310   :  { %2843 = vpow2.f32 %v1552_v51  ;;  %v1545_v49 = vsub.f32 %v3391_v34, %v1533_v33  ;;  %v1531_v0 = vpop.xlane.xlu1 %1530  ;;  %v3455_v34 = vadd.s32 4294967294, %v3140_v52 }
 0x311   :  { %2845 = vpow2.f32 %v1550_v9  ;;  %v1544_v29 = vsub.f32 %v3395_v61, %v1531_v0 }
 0x312   :  { %v1556_v35 = vmul.f32 1.442695, %v1545_v49  ;;  %vm665_vm9 = vcmp.ge.s32.totalorder %v3455_v34, 0 }
 0x313   :  { %v1537_v20 = vpop.xlane.xlu0 %1536  ;;  %v1554_v41 = vmul.f32 1.442695, %v1544_v29 }
 0x314   :  { %v1535_v7 = vpop.xlane.xlu1 %1534  ;;  %2847 = vpow2.f32 %v1556_v35  ;;  %v1547_v61 = vsub.f32 %v3412_v11, %v1537_v20 }
 0x315   :  { %v1546_v22 = vsub.f32 %v1497_v19, %v1535_v7 }
 0x316   :  { %v1560_v11 = vmul.f32 1.442695, %v1547_v61 }
 0x317   :  { %v1558_v58 = vmul.f32 1.442695, %v1546_v22  ;;  %v3452_v5 = vpop.xlane.xlu0 %1540 }
 0x318   :  { %v3461_v19 = vpop.xlane.xlu1 %1538 }
 0x319   :  { %2849 = vpow2.f32 %v1558_v58 }
 0x31a   :  { %v3463_v12 = vpop.eup %2843  ;;  %2851 = vpow2.f32 %v1554_v41 }
 0x31b   :  { %1568 = vadd.xlane.f32.xlu0 %v3463_v12  ;;  %v612_v51 = vpop.permute.xlu0 %611  ;;  %v3489_v35 = vpop.eup %2845  ;;  %2853 = vpow2.f32 %v1560_v11 }
 0x31c   :  { %v622_v45 = vsel %vm619_vm3, %v612_v51, %v3197_v55  ;;  %v623_v33 = vsel %vm619_vm3, %v3174_v39, %v612_v51  ;;  %v649_v9 = vpop.permute.xlu1 %648 }
 0x31d   :  { %v640_v49 = vsel %vm3986_vm0, %v623_v33, 0.0  ;;  %v641_v0 = vsel %vm629_vm15, %v622_v45, 0.0  ;;  %v659_v20 = vsel %vm656_vm1, %v649_v9, %v3176_v40  ;;  %v660_v55 = vsel %vm656_vm1, %v3158_v26, %v649_v9 }
 0x31e   :  { %644 = vst [vmem:[#allocation2] sm:$0xf] %v640_v49  ;;  %645 = vst [vmem:[#allocation2 + $0x8] sm:$0xf] %v641_v0  ;;  %v678_v39 = vsel %vm666_vm11, %v659_v20, 0.0  ;;  %vm3988_vm0 = vcmp.ge.s32.totalorder %v3471_v32, 0  ;;  %v3511_v51 = vpop.eup %2847 }
 0x31f   :  { %v677_v29 = vsel %vm665_vm9, %v660_v55, 0.0  ;;  %v686_v7 = vrot.slane %v678_v39, 4  ;;  %1566 = vadd.xlane.f32.xlu0 %v3489_v35  ;;  %v698_v40 = vpop.permute.xlu0 %697  ;;  %v3528_v55 = vrot.slane %v3436_v46, %v3073_v42  ;;  %v3534_v39 = vrot.slane %v3434_v50, %v3073_v42 }
 0x320   :  { %v685_v22 = vrot.slane %v677_v29, 4  ;;  %v708_v26 = vsel %vm705_vm6, %v698_v40, %v3218_v54  ;;  %v709_v58 = vsel %vm705_vm6, %v3195_v30, %v698_v40  ;;  %v1549_v46 = vsub.f32 %v3416_v4, %v3452_v5 }
 0x321   :  { %694 = vst [vmem:[#allocation2 + $0x8] sm:$0xf0] %v686_v7  ;;  %v726_v41 = vsel %vm3987_vm4, %v709_v58, 0.0  ;;  %v727_v61 = vsel %vm3988_vm0, %v708_v26, 0.0  ;;  %v1548_v29 = vsub.f32 %v3419_v53, %v3461_v19  ;;  %v3576_v40 = vcombine.high %v3534_v39, %v3534_v39 }
 0x322   :  { %693 = vst [vmem:[#allocation2] sm:$0xf0] %v685_v22  ;;  %730 = vst [vmem:[#allocation2 + $0x20] sm:$0xf] %v726_v41  ;;  %v3582_v22 = vcombine.high %v3528_v55, %v3528_v55  ;;  %v1993_v26 = vcombine.low %v3528_v55, %v3528_v55 }
 0x323   :  { %731 = vst [vmem:[#allocation2 + $0x28] sm:$0xf] %v727_v61  ;;  %v3513_v11 = vpop.eup %2849  ;;  %1572 = vadd.xlane.f32.xlu0 %v3511_v51  ;;  %v1562_v7 = vmul.f32 1.442695, %v1548_v29 }
 0x324   :  { %1574 = vadd.xlane.f32.xlu1 %v3513_v11  ;;  %v3517_v54 = vpop.eup %2851  ;;  %1998 = vst [vmem:[#allocation2 + $0x30] sm:$0xf0] %v1993_v26  ;;  %v3630_v26 = vadd.s32 1, %v3140_v52 }
 0x325   :  { %v3520_v49 = vpop.eup %2853 }
 0x327   :  { %1570 = vadd.xlane.f32.xlu0 %v3517_v54 }
 0x328   :  { %v868_v30 = vld [vmem:[#allocation2 + $0x8] sm:$0xff] }
 0x329   :  { %v867_v33 = vld [vmem:[#allocation2] sm:$0xff] }
 0x32a   :  { %v872_v45 = vld [vmem:[#allocation2 + $0x28] sm:$0xff]  ;;  %v871_v9 = vld [vmem:[#allocation2 + $0x20] sm:$0xff] }
 0x32b   :  { %v2731_v0 = vpack.c.bf16 %v872_v45, %v868_v30  ;;  %v2733_v20 = vpack.c.bf16 %v871_v9, %v867_v33  ;;  %2595 = vst.sshfl [vmem:[#allocation2 + $0x28] sm:$0xcc pattern:$0x76325410] %v3434_v50  ;;  %1576 = vadd.xlane.f32.xlu0 %v3520_v49  ;;  %v1564_v50 = vmul.f32 1.442695, %v1549_v46 }
 0x32c   :  { %v3611_v30 = vadd.s32 2, %v3140_v52  ;;  %v3614_v45 = vadd.s32 2, %v3443_v23 }
 0x32d   :  { %2732 = vmatprep.subr.bf16.mxu1 %v2731_v0  ;;  %2855 = vpow2.f32 %v1564_v50 }
 0x32e   :  { %2734 = vmatpush1.bf16.msra.mxu1 %v2733_v20  ;;  %2857 = vpow2.f32 %v1562_v7  ;;  %vm3990_vm4 = vcmp.lt.s32.totalorder %v3611_v30, 128  ;;  %vm3989_vm0 = vcmp.lt.s32.totalorder %v3614_v45, 128 }
 0x335   :  { %781 = vrot.lane.b32.xlu1 %v3087_v47, %s2906_s19 }
 0x337   :  { %v3560_v4 = vpop.eup %2855 }
 0x338   :  { %v3565_v53 = vpop.eup %2857 }
 0x339   :  { %1944 = vrot.lane.b32.xlu1 %v3528_v55, %s2902_s15 }
 0x33d   :  { %1920 = vrot.lane.b32.xlu1 %v3534_v39, %s2901_s1 }
 0x341   :  { %744 = vrot.lane.b32.xlu0 %v3087_v47, %s2904_s17  ;;  %1924 = vrot.lane.b32.xlu1 %v3528_v55, %s2901_s1 }
 0x345   :  { %1972 = vrot.lane.b32.xlu1 %v3534_v39, %s2903_s16 }
 0x349   :  { %1976 = vrot.lane.b32.xlu1 %v3528_v55, %s2903_s16 }
 0x34d   :  { %2020 = vrot.lane.b32.xlu1 %v3534_v39, %s2906_s19 }
 0x351   :  { %2024 = vrot.lane.b32.xlu1 %v3528_v55, %s2906_s19 }
 0x355   :  { %2000 = vrot.lane.b32.xlu1 %v3534_v39, %s2904_s17 }
 0x359   :  { %2004 = vrot.lane.b32.xlu1 %v3528_v55, %s2904_s17 }
 0x35d   :  { %2052 = vrot.lane.b32.xlu1 %v3534_v39, %s2905_s18 }
 0x360   :  { %1580 = vadd.xlane.f32.xlu0 %v3560_v4 }
 0x361   :  { %2056 = vrot.lane.b32.xlu1 %v3528_v55, %s2905_s18 }
 0x364   :  { %1578 = vadd.xlane.f32.xlu0 %v3565_v53 }
 0x36d   :  { %v3568_v5 = vpop.f32.mrb[0].mxu1 }
 0x36e   :  { %v609_v19 = vpop.f32.mrb[1].mxu1 }
 0x37a   :  { %830 = vrot.lane.b32.xlu0 %v3087_v47, %s2905_s18  ;;  %v1992_v47 = vcombine.low %v3534_v39, %v3534_v39 }
 0x37c   :  { %1996 = vst [vmem:[#allocation2 + $0x20] sm:$0xf0] %v1992_v47 }
 0x37e   :  { %1940 = vrot.lane.b32.xlu0 %v3534_v39, %s2902_s15 }
 0x382   :  { %1942 = vrot.lane.b32.xlu0 %v3576_v40, %s2902_s15 }
 0x386   :  { %1946 = vrot.lane.b32.xlu0 %v3582_v22, %s2902_s15 }
 0x38a   :  { %1922 = vrot.lane.b32.xlu0 %v3576_v40, %s2901_s1 }
 0x38e   :  { %1926 = vrot.lane.b32.xlu0 %v3582_v22, %s2901_s1 }
 0x392   :  { %1974 = vrot.lane.b32.xlu0 %v3576_v40, %s2903_s16 }
 0x396   :  { %1978 = vrot.lane.b32.xlu0 %v3582_v22, %s2903_s16 }
 0x39a   :  { %2022 = vrot.lane.b32.xlu0 %v3576_v40, %s2906_s19 }
 0x39e   :  { %2026 = vrot.lane.b32.xlu0 %v3582_v22, %s2906_s19 }
 0x3a2   :  { %2002 = vrot.lane.b32.xlu0 %v3576_v40, %s2904_s17 }
 0x3a6   :  { %2006 = vrot.lane.b32.xlu0 %v3582_v22, %s2904_s17 }
 0x3a8   :  { %v1569_v58 = vpop.xlane.xlu0 %1568 }
 0x3a9   :  { %2859 = vrcp.f32 %v1569_v58 }
 0x3aa   :  { %2054 = vrot.lane.b32.xlu0 %v3576_v40, %s2905_s18 }
 0x3ac   :  { %v1567_v41 = vpop.xlane.xlu0 %1566 }
 0x3ad   :  { %2861 = vrcp.f32 %v1567_v41 }
 0x3ae   :  { %2058 = vrot.lane.b32.xlu0 %v3582_v22, %s2905_s18 }
 0x3b0   :  { %v1573_v61 = vpop.xlane.xlu0 %1572 }
 0x3b1   :  { %2863 = vrcp.f32 %v1573_v61  ;;  %v1575_v33 = vpop.xlane.xlu1 %1574 }
 0x3b2   :  { %2865 = vrcp.f32 %v1575_v33 }
 0x3b3   :  { %v2860_v9 = vpop.eup %2859 }
 0x3b4   :  { %v1571_v0 = vpop.xlane.xlu0 %1570  ;;  %v1591_v46 = vmul.f32 %v2860_v9, %v3463_v12  ;;  %v3633_v12 = vadd.s32 1, %v3443_v23 }
 0x3b5   :  { %2867 = vrcp.f32 %v1571_v0  ;;  %v782_v20 = vpop.permute.xlu1 %781 }
 0x3b6   :  { %v789_v50 = vsel %vm787_vm12, %v782_v20, %v3160_v27  ;;  %v790_v29 = vsel %vm787_vm12, %v3150_v63, %v782_v20  ;;  %v1611_v33 = vrot.slane %v1591_v46, %v3068_v36 }
 0x3b7   :  { %v2862_v7 = vpop.eup %2861  ;;  %v808_v19 = vsel %vm3990_vm4, %v790_v29, 0.0  ;;  %v809_v47 = vsel %vm3989_vm0, %v789_v50, 0.0  ;;  %vm3992_vm0 = vcmp.lt.s32.totalorder %v3630_v26, 128  ;;  %vm3991_vm4 = vcmp.lt.s32.totalorder %v3633_v12, 128 }
 0x3b8   :  { %v1590_v58 = vmul.f32 %v2862_v7, %v3489_v35  ;;  %v816_v27 = vrot.slane %v808_v19, 4  ;;  %v817_v41 = vrot.slane %v809_v47, 4  ;;  %v1577_v61 = vpop.xlane.xlu0 %1576 }
 0x3b9   :  { %2869 = vrcp.f32 %v1577_v61 }
 0x3ba   :  { %824 = vst [vmem:[#allocation2 + $0x40] sm:$0xf0] %v816_v27  ;;  %825 = vst [vmem:[#allocation2 + $0x48] sm:$0xf0] %v817_v41  ;;  %v1604_v63 = vrot.slane %v1590_v58, %v3068_v36 }
 0x3bb   :  { %v2864_v9 = vpop.eup %2863 }
 0x3bc   :  { %v745_v0 = vpop.permute.xlu0 %744  ;;  %v1700_v20 = vcombine.low %v1604_v63, %v1611_v33  ;;  %v1701_v50 = vcombine.high %v1604_v63, %v1611_v33  ;;  %v2866_v7 = vpop.eup %2865  ;;  %v1593_v19 = vmul.f32 %v2864_v9, %v3511_v51 }
 0x3bd   :  { %v752_v35 = vsel %vm750_vm10, %v745_v0, %v3256_v38  ;;  %v753_v29 = vsel %vm750_vm10, %v3144_v59, %v745_v0  ;;  %v1594_v38 = vmul.f32 %v2866_v7, %v3513_v11 }
 0x3be   :  { %v771_v46 = vsel %vm3992_vm0, %v753_v29, 0.0  ;;  %v772_v47 = vsel %vm3991_vm4, %v752_v35, 0.0  ;;  %v1625_v59 = vrot.slane %v1593_v19, %v3068_v36  ;;  %v3658_v0 = vrot.slane %v1700_v20, %v3073_v42 }
 0x3bf   :  { %v2868_v58 = vpop.eup %2867  ;;  %775 = vst [vmem:[#allocation2 + $0x40] sm:$0xf] %v771_v46  ;;  %776 = vst [vmem:[#allocation2 + $0x48] sm:$0xf] %v772_v47  ;;  %v1632_v9 = vrot.slane %v1594_v38, %v3068_v36  ;;  %v3665_v11 = vrot.slane %v1701_v50, %v3073_v42  ;;  %v3681_v38 = vadd.s32 3, %v3140_v52  ;;  %v2072_v52 = vld [vmem:[%s3958_s2] sm:$0xff] }
 0x3c0   :  { %v1592_v27 = vmul.f32 %v2868_v58, %v3517_v54  ;;  %v1945_v58 = vpop.permute.xlu1 %1944 }
 0x3c1   :  { %vm849_vm4 = vcmp.lt.s32.totalorder %v3681_v38, 128 }
 0x3c2   :  { %v1618_v41 = vrot.slane %v1592_v27, %v3068_v36 }
 0x3c3   :  { %v2870_v61 = vpop.eup %2869 }
 0x3c4   :  { %v1595_v51 = vmul.f32 %v2870_v61, %v3520_v49  ;;  %v1702_v63 = vcombine.low %v1618_v41, %v1625_v59  ;;  %v1703_v33 = vcombine.high %v1618_v41, %v1625_v59  ;;  %v3678_v27 = vpop.permute.xlu1 %1920  ;;  %v3684_v41 = vadd.s32 3, %v3443_v23 }
 0x3c6   :  { %v1639_v35 = vrot.slane %v1595_v51, %v3068_v36  ;;  %v3662_v54 = vrot.slane %v1702_v63, %v3073_v42  ;;  %v3668_v29 = vrot.slane %v1703_v33, %v3073_v42  ;;  %vm850_vm0 = vcmp.lt.s32.totalorder %v3684_v41, 128 }
 0x3c8   :  { %v1736_v7 = vcombine.low %v1632_v9, %v1639_v35  ;;  %v1737_v46 = vcombine.high %v1632_v9, %v1639_v35  ;;  %v3686_v61 = vpop.permute.xlu1 %1924  ;;  %v4021_v17 = vcombine.high %v3665_v11, %v3668_v29 }
 0x3ed   :  { %v1581_v50 = vpop.xlane.xlu0 %1580 }
 0x3ee   :  { %2871 = vrcp.f32 %v1581_v50 }
 0x3f1   :  { %v1579_v59 = vpop.xlane.xlu0 %1578 }
 0x3f2   :  { %2873 = vrcp.f32 %v1579_v59  ;;  %v3700_v59 = vpop.permute.xlu1 %1972 }
 0x3f5   :  { %v831_v51 = vpop.permute.xlu0 %830 }
 0x3f6   :  { %v838_v63 = vsel %vm836_vm13, %v831_v51, %v3258_v44  ;;  %v839_v33 = vsel %vm836_vm13, %v3148_v62, %v831_v51 }
 0x3f7   :  { %v857_v23 = vsel %vm849_vm4, %v839_v33, 0.0  ;;  %v858_v9 = vsel %vm850_vm0, %v838_v63, 0.0  ;;  %v876_v33 = vld [vmem:[#allocation2 + $0x48] sm:$0xff]  ;;  %v875_v63 = vld [vmem:[#allocation2 + $0x40] sm:$0xff] }
 0x3f8   :  { %v2872_v35 = vpop.eup %2871  ;;  %861 = vst [vmem:[#allocation2 + $0x60] sm:$0xf] %v857_v23  ;;  %862 = vst [vmem:[#allocation2 + $0x68] sm:$0xf] %v858_v9 }
 0x3f9   :  { %v1941_v50 = vpop.permute.xlu0 %1940  ;;  %v1597_v3 = vmul.f32 %v2872_v35, %v3560_v4  ;;  %v3712_v35 = vpop.permute.xlu1 %1976 }
 0x3fc   :  { %v2874_v2 = vpop.eup %2873 }
 0x3fd   :  { %v1596_v44 = vmul.f32 %v2874_v2, %v3565_v53  ;;  %v1943_v48 = vpop.permute.xlu0 %1942  ;;  %v1653_v53 = vrot.slane %v1597_v3, %v3068_v36  ;;  %v1753_v3 = vrot.slane %v1737_v46, %v3073_v42 }
 0x3fe   :  { %v1949_v62 = vsel %vm656_vm1, %v1943_v48, %v1945_v58  ;;  %v1950_v51 = vsel %vm656_vm1, %v1941_v50, %v1943_v48 }
 0x3ff   :  { %v1953_v23 = vsel %vm666_vm11, %v1950_v51, 0.0  ;;  %v1954_v9 = vsel %vm667_vm5, %v1949_v62, 0.0  ;;  %v880_v47 = vld [vmem:[#allocation2 + $0x68] sm:$0xf]  ;;  %v879_v4 = vld [vmem:[#allocation2 + $0x60] sm:$0xf]  ;;  %v1646_v2 = vrot.slane %v1596_v44, %v3068_v36  ;;  %v1746_v36 = vrot.slane %v1736_v7, %v3073_v42  ;;  %v3733_v44 = vpop.permute.xlu1 %2020 }
 0x400   :  { %v1961_v20 = vrot.slane %v1953_v23, 4  ;;  %v1962_v19 = vrot.slane %v1954_v9, 4  ;;  %v2735_v49 = vpack.c.bf16 %v880_v47, %v876_v33  ;;  %v2738_v48 = vpack.c.bf16 %v879_v4, %v875_v63 }
 0x401   :  { %v1947_v21 = vpop.permute.xlu0 %1946  ;;  %v1738_v14 = vcombine.low %v1646_v2, %v1653_v53  ;;  %v1739_v24 = vcombine.high %v1646_v2, %v1653_v53  ;;  %v4018_v63 = vpack.c.bf16 %v3036_v15, %v3038_v16  ;;  %v4019_v23 = vcombine.high %v3658_v0, %v3662_v54 }
 0x402   :  { %1969 = vst [vmem:[#allocation2 + $0x8] sm:$0xf0] %v1961_v20  ;;  %1970 = vst [vmem:[#allocation2 + $0x10] sm:$0xf0] %v1962_v19  ;;  %v1948_v25 = vsel %vm656_vm1, %v1945_v58, %v1947_v21  ;;  %v1951_v6 = vsel %vm656_vm1, %v1947_v21, %v1941_v50  ;;  %2737 = vmatprep.subr.msk.bf16.mxu1 %vm3270_vm14, %v2735_v49  ;;  %v2909_v49 = vmov 0.0|0.0   ;;  %v4020_v4 = vcombine.low %v3658_v0, %v3662_v54 }
 0x403   :  { %v1952_v47 = vsel %vm665_vm9, %v1951_v6, 0.0  ;;  %v1955_v20 = vsel %vm668_vm2, %v1948_v25, 0.0  ;;  %2740 = vmatpush1.bf16.msk.msra.mxu1 %vm3270_vm14, %v2738_v48  ;;  %v1760_v19 = vrot.slane %v1738_v14, %v3073_v42  ;;  %v1767_v21 = vrot.slane %v1739_v24, %v3073_v42 }
 0x404   :  { %v1960_v58 = vrot.slane %v1952_v47, 4  ;;  %v1963_v50 = vrot.slane %v1955_v20, 4  ;;  %2751 = vmatprep.subr.bf16.mxu1 %v2909_v49  ;;  %v4022_v53 = vcombine.low %v3665_v11, %v3668_v29  ;;  %vm4023_vm1 = vcmp.ge.s32.totalorder %v3447_v1, 0  ;;  %v2025_v29 = vpop.permute.xlu1 %2024  ;;  %v4029_v20 = vld [vmem:[#allocation6_spill] sm:$0xff] }
 0x405   :  { %v1923_v7 = vpop.permute.xlu0 %1922  ;;  %v1769_v46 = vcombine.high %v1746_v36, %v1760_v19  ;;  %v1768_v34 = vcombine.low %v1746_v36, %v1760_v19  ;;  %v1771_v62 = vcombine.high %v1753_v3, %v1767_v21  ;;  %v1770_v60 = vcombine.low %v1753_v3, %v1767_v21  ;;  %v4024_v36 = vld [vmem:[#allocation9_spill] sm:$0xff]  ;;  %v4027_v3 = vld [vmem:[#allocation12_spill] sm:$0xff]  ;;  %v4030_v19 = vld [vmem:[#allocation7_spill] sm:$0xff] }
 0x406   :  { %1968 = vst [vmem:[#allocation2] sm:$0xf0] %v1960_v58  ;;  %1971 = vst [vmem:[#allocation2 + $0x18] sm:$0xf0] %v1963_v50  ;;  %v1929_v14 = vsel %vm619_vm3, %v1923_v7, %v3686_v61  ;;  %v1930_v42 = vsel %vm619_vm3, %v3678_v27, %v1923_v7  ;;  %2572 = vmatmul.mubr.msk.f32.vlgmr.msra.gmra.mrb[2].mxu1 %vm883_vm7, %v3284_v31  ;;  %vm4025_vm2 = vcmp.ge.s32.totalorder %v4024_v36, 0  ;;  %vm2910_vm5 = vmmov 0  }
 0x407   :  { %v1933_v24 = vsel %vm629_vm15, %v1930_v42, 0.0  ;;  %v1934_v33 = vsel %vm630_vm8, %v1929_v14, 0.0  ;;  %2753 = vmatpush3.bf16.msra.mxu1 %v4018_v63  ;;  %973 = vmatprep.mubr.f32.mxu1 %v4013_v37  ;;  %v2757_v9 = vpack.c.bf16 %v1769_v46, %v4019_v23  ;;  %v2759_v31 = vpack.c.bf16 %v1768_v34, %v4020_v4  ;;  %v4033_v34 = vld [vmem:[#allocation10_spill] sm:$0xff] }
 0x408   :  { %1937 = vst [vmem:[#allocation2 + $0x8] sm:$0xf] %v1933_v24  ;;  %1938 = vst [vmem:[#allocation2 + $0x10] sm:$0xf] %v1934_v33  ;;  %2754 = vmatprep.subr.bf16.mxu1 %v2909_v49  ;;  %v2761_v2 = vpack.c.bf16 %v1771_v62, %v4021_v17  ;;  %v3764_v48 = vpack.c.bf16 %v1770_v60, %v4022_v53  ;;  %vm1122_vm8 = vcmask 130048   ;;  %vm4028_vm9 = vcmp.ge.s32.totalorder %v4027_v3, 0  ;;  %v2001_v50 = vpop.permute.xlu1 %2000 }
 0x409   :  { %v1927_v25 = vpop.permute.xlu0 %1926  ;;  %v4031_v21 = vpack.c.bf16 %v4029_v20, %v4030_v19  ;;  %vm4032_vm11 = vcmp.ge.s32.totalorder %v3468_v18, 0  ;;  %vm4034_vm15 = vcmp.ge.s32.totalorder %v4033_v34, 0  ;;  %v4037_v4 = vld [vmem:[#allocation14_spill] sm:$0xff] }
 0x40a   :  { %v1928_v6 = vsel %vm619_vm3, %v3686_v61, %v1927_v25  ;;  %v1931_v0 = vsel %vm619_vm3, %v1927_v25, %v3678_v27  ;;  %2573 = vmatmul.mubr.msk.f32.gmra.mrb[4].mxu1 %vm883_vm7, %v3292_v57  ;;  %vm4026_vm3 = vcmp.ge.s32.totalorder %v3471_v32, 0 }
 0x40b   :  { %v1932_v54 = vsel %vm4023_vm1, %v1931_v0, 0.0  ;;  %v1935_v11 = vsel %vm4025_vm2, %v1928_v6, 0.0  ;;  %2676 = vmatprep.mubr.msk.f32.mxu1 %vm2910_vm5, %v4013_v37  ;;  %vm4036_vm1 = vcmp.lt.s32.totalorder %v3614_v45, 128  ;;  %vm4038_vm2 = vcmp.lt.s32.totalorder %v4037_v4, 128 }
 0x40c   :  { %1936 = vst [vmem:[#allocation2] sm:$0xf] %v1932_v54  ;;  %1939 = vst [vmem:[#allocation2 + $0x18] sm:$0xf] %v1935_v11  ;;  %v2005_v14 = vpop.permute.xlu1 %2004  ;;  %v4051_v4 = vpack.c.bf16 %v3353_v10, %v3355_v43 }
 0x40d   :  { %v1975_v61 = vpop.permute.xlu0 %1974 }
 0x40e   :  { %v1981_v27 = vsel %vm705_vm6, %v1975_v61, %v3712_v35  ;;  %v1982_v57 = vsel %vm705_vm6, %v3700_v59, %v1975_v61  ;;  %2677 = vmatmul.mubr.msk.f32.vlgmr.msra.gmra.mrb[6].mxu1 %vm1122_vm8, %v3568_v5 }
 0x40f   :  { %v1985_v1 = vsel %vm4026_vm3, %v1982_v57, 0.0  ;;  %v1986_v47 = vsel %vm4028_vm9, %v1981_v27, 0.0  ;;  %2756 = vmatpush3.bf16.msra.mxu1 %v4031_v21  ;;  %2683 = vmatprep.mubr.msk.f32.mxu1 %vm2910_vm5, %v4013_v37  ;;  %v2075_v45 = vld [vmem:[#allocation2 + $0x8] sm:$0xff]  ;;  %vm4042_vm9 = vcmp.lt.s32.totalorder %v3633_v12, 128 }
 0x410   :  { %1989 = vst [vmem:[#allocation2 + $0x28] sm:$0xf] %v1985_v1  ;;  %1990 = vst [vmem:[#allocation2 + $0x30] sm:$0xf] %v1986_v47  ;;  %2758 = vmatprep.subr.bf16.mxu1 %v2757_v9  ;;  %v2053_v11 = vpop.permute.xlu1 %2052  ;;  %v4043_v21 = vld [vmem:[#allocation17_spill] sm:$0xff] }
 0x411   :  { %v1979_v58 = vpop.permute.xlu0 %1978 }
 0x412   :  { %v1980_v32 = vsel %vm705_vm6, %v3712_v35, %v1979_v58  ;;  %v1983_v7 = vsel %vm705_vm6, %v1979_v58, %v3700_v59  ;;  %2684 = vmatmul.mubr.msk.f32.vlgmr.msra.gmra.mrb[8].mxu1 %vm1122_vm8, %v3568_v5  ;;  %vm4035_vm6 = vcmp.lt.s32.totalorder %v3611_v30, 128  ;;  %v4045_v58 = vld [vmem:[#allocation13_spill] sm:$0xff] }
 0x413   :  { %v1984_v46 = vsel %vm4032_vm11, %v1983_v7, 0.0  ;;  %v1987_v62 = vsel %vm4034_vm15, %v1980_v32, 0.0  ;;  %1844 = vmatprep.mubr.f32.mxu1 %v3576_v40  ;;  %v2076_v40 = vld [vmem:[#allocation2 + $0x10] sm:$0xff]  ;;  %v2077_v63 = vld [vmem:[#allocation2 + $0x18] sm:$0xff]  ;;  %v2074_v3 = vld [vmem:[#allocation2] sm:$0xff]  ;;  %vm4044_vm11 = vcmp.lt.s32.totalorder %v4043_v21, 128 }
 0x414   :  { %1988 = vst [vmem:[#allocation2 + $0x20] sm:$0xf] %v1984_v46  ;;  %1991 = vst [vmem:[#allocation2 + $0x38] sm:$0xf] %v1987_v62  ;;  %vm4046_vm15 = vcmp.lt.s32.totalorder %v4045_v58, 128  ;;  %v2057_v7 = vpop.permute.xlu1 %2056 }
 0x415   :  { %v2023_v60 = vpop.permute.xlu0 %2022 }
 0x416   :  { %v2029_v35 = vsel %vm787_vm12, %v2023_v60, %v2025_v29  ;;  %v2030_v59 = vsel %vm787_vm12, %v3733_v44, %v2023_v60 }
 0x417   :  { %v2032_v5 = vsel %vm4035_vm6, %v2030_v59, 0.0  ;;  %v2033_v18 = vsel %vm4036_vm1, %v2029_v35, 0.0  ;;  %v2080_v51 = vld [vmem:[#allocation2 + $0x30] sm:$0xff]  ;;  %v2079_v9 = vld [vmem:[#allocation2 + $0x28] sm:$0xff] }
 0x418   :  { %v2040_v42 = vrot.slane %v2032_v5, 4  ;;  %v2041_v24 = vrot.slane %v2033_v18, 4  ;;  %2760 = vmatpush1.bf16.xpose.msra.mxu1 %v2759_v31  ;;  %v4039_v31 = vld [vmem:[#allocation15_spill] sm:$0xff]  ;;  %v2777_v25 = vpack.c.bf16 %v2080_v51, %v2076_v40  ;;  %v4047_v5 = vld [vmem:[#allocation18_spill] sm:$0xff]  ;;  %v4049_v18 = vld [vmem:[#allocation16_spill] sm:$0xff] }
 0x419   :  { %2762 = vmatprep.subr.bf16.mxu1 %v2761_v2  ;;  %v2027_v33 = vpop.permute.xlu0 %2026  ;;  %vm4040_vm3 = vcmp.lt.s32.totalorder %v4039_v31, 128 }
 0x41a   :  { %2048 = vst [vmem:[#allocation2 + $0x40] sm:$0xf0] %v2040_v42  ;;  %2049 = vst [vmem:[#allocation2 + $0x48] sm:$0xf0] %v2041_v24  ;;  %v2028_v23 = vsel %vm787_vm12, %v2025_v29, %v2027_v33  ;;  %v2031_v30 = vsel %vm787_vm12, %v2027_v33, %v3733_v44  ;;  %v2765_v29 = vpack.c.bf16 %v2079_v9, %v2075_v45  ;;  %vm4041_vm12 = vcmp.lt.s32.totalorder %v3630_v26, 128 }
 0x41b   :  { %v2034_v17 = vsel %vm4038_vm2, %v2028_v23, 0.0  ;;  %v2035_v53 = vsel %vm4040_vm3, %v2031_v30, 0.0  ;;  %v2081_v2 = vld [vmem:[#allocation2 + $0x38] sm:$0xff]  ;;  %v2078_v47 = vld [vmem:[#allocation2 + $0x20] sm:$0xff] }
 0x41c   :  { %v2042_v6 = vrot.slane %v2034_v17, 4  ;;  %v2043_v0 = vrot.slane %v2035_v53, 4  ;;  %v2775_v54 = vpack.c.bf16 %v2081_v2, %v2077_v63  ;;  %v2073_v17 = vld [vmem:[%s3958_s2 + $0x8] sm:$0xff]  ;;  %s2912_s2 = smov [#allocation3]  }
 0x41d   :  { %v2003_v36 = vpop.permute.xlu0 %2002  ;;  %s2543_s29 = sshll.u32 %s2912_s2, 4  ;;  %s2544_s29 = int_to_ptr.vmem [resolvable:$true] %s2543_s29 }
 0x41e   :  { %2050 = vst [vmem:[#allocation2 + $0x50] sm:$0xf0] %v2042_v6  ;;  %2051 = vst [vmem:[#allocation2 + $0x58] sm:$0xf0] %v2043_v0  ;;  %v2009_v44 = vsel %vm750_vm10, %v2003_v36, %v2005_v14  ;;  %v2010_v61 = vsel %vm750_vm10, %v2001_v50, %v2003_v36  ;;  %2776 = vmatprep.subr.bf16.mxu0 %v2775_v54  ;;  %s2875_s30 = scalar_lea.vmem %s2544_s29, 256  ;;  %p2880_p1 = scmp.lt.s32.totalorder %s2544_s29, %s2544_s29 }
 0x41f   :  { %v2012_v27 = vsel %vm4041_vm12, %v2010_v61, 0.0  ;;  %v2013_v57 = vsel %vm4042_vm9, %v2009_v44, 0.0  ;;  %1845 = vmatmul.mubr.f32.vlgmr.msra.gmra.mrb[10].mxu1 %v3534_v39  ;;  %2778 = vmatpush1.bf16.msra.mxu0 %v2777_v25  ;;  %p2876_p0 = scmp.ne.s32.totalorder %s2544_s29, %s2875_s30  ;;  %p2881_p2 = scmp.lt.s32.totalorder %s2875_s30, %s2875_s30 }
 0x420   :  { %2016 = vst [vmem:[#allocation2 + $0x40] sm:$0xf] %v2012_v27  ;;  %2017 = vst [vmem:[#allocation2 + $0x48] sm:$0xf] %v2013_v57  ;;  %2764 = vmatpush1.bf16.xpose.msra.mxu1 %v3764_v48  ;;  %1914 = vmatprep.mubr.f32.mxu1 %v3582_v22  ;;  %v2767_v22 = vpack.c.bf16 %v2078_v47, %v2074_v3 }
 0x421   :  { %v2007_v1 = vpop.permute.xlu0 %2006  ;;  %2766 = vmatprep.subr.bf16.mxu1 %v2765_v29  ;;  %p2882_p3 = por %p2881_p2, %p2880_p1 }
 0x422   :  { %v2008_v26 = vsel %vm750_vm10, %v2005_v14, %v2007_v1  ;;  %v2011_v12 = vsel %vm750_vm10, %v2007_v1, %v2001_v50  ;;  %vm4048_vm10 = vcmp.lt.s32.totalorder %v4047_v5, 128 }
 0x423   :  { %v2014_v39 = vsel %vm4044_vm11, %v2008_v26, 0.0  ;;  %v2015_v32 = vsel %vm4046_vm15, %v2011_v12, 0.0  ;;  %p2883_p4 = pnand %p2882_p3, %p2876_p0 }
 0x424   :  { %2018 = vst [vmem:[#allocation2 + $0x50] sm:$0xf] %v2014_v39  ;;  %2019 = vst [vmem:[#allocation2 + $0x58] sm:$0xf] %v2015_v32  ;;  %v2911_v32 = vmov 1966171168  }
 0x425   :  { %v2055_v48 = vpop.permute.xlu0 %2054 }
 0x426   :  { %v2061_v46 = vsel %vm836_vm13, %v2055_v48, %v2057_v7  ;;  %v2062_v34 = vsel %vm836_vm13, %v2053_v11, %v2055_v48 }
 0x427   :  { %v2064_v50 = vsel %vm849_vm4, %v2062_v34, 0.0  ;;  %v2065_v62 = vsel %vm850_vm0, %v2061_v46, 0.0  ;;  %1915 = vmatmul.mubr.f32.vlgmr.msra.gmra.mrb[10].mxu1 %v3528_v55  ;;  %vm4050_vm4 = vcmp.lt.s32.totalorder %v4049_v18, 128  ;;  %v2083_v55 = vld [vmem:[#allocation2 + $0x48] sm:$0xff]  ;;  %v2082_v14 = vld [vmem:[#allocation2 + $0x40] sm:$0xff] }
 0x428   :  { %2068 = vst [vmem:[#allocation2 + $0x60] sm:$0xf] %v2064_v50  ;;  %2069 = vst [vmem:[#allocation2 + $0x68] sm:$0xf] %v2065_v62  ;;  %2768 = vmatpush1.bf16.msra.mxu1 %v2767_v22  ;;  %2172 = vmatprep.mubr.f32.mxu1 %v4013_v37 }
 0x429   :  { %v2059_v60 = vpop.permute.xlu0 %2058 }
 0x42a   :  { %v2060_v35 = vsel %vm836_vm13, %v2057_v7, %v2059_v60  ;;  %v2063_v59 = vsel %vm836_vm13, %v2059_v60, %v2053_v11  ;;  %v1100_v7 = vunpack.c.l.s4 %v2911_v32 }
 0x42b   :  { %v2066_v38 = vsel %vm4048_vm10, %v2060_v35, 0.0  ;;  %v2067_v41 = vsel %vm4050_vm4, %v2063_v59, 0.0  ;;  %v2085_v33 = vld [vmem:[#allocation2 + $0x58] sm:$0xff]  ;;  %v2084_v63 = vld [vmem:[#allocation2 + $0x50] sm:$0xff] }
 0x42c   :  { %2070 = vst [vmem:[#allocation2 + $0x70] sm:$0xf] %v2066_v38  ;;  %2071 = vst [vmem:[#allocation2 + $0x78] sm:$0xf] %v2067_v41  ;;  %v1101_v59 = vunpack.c.0.s8 %v1100_v7 }
 0x42f   :  { %v2087_v42 = vld [vmem:[#allocation2 + $0x68] sm:$0xf]  ;;  %v2086_v24 = vld [vmem:[#allocation2 + $0x60] sm:$0xf] }
 0x430   :  { %v2769_v40 = vpack.c.bf16 %v2087_v42, %v2083_v55  ;;  %v2772_v51 = vpack.c.bf16 %v2086_v24, %v2082_v14 }
 0x432   :  { %2771 = vmatprep.subr.msk.bf16.mxu1 %vm3270_vm14, %v2769_v40  ;;  %v4052_v40 = vld [vmem:[#allocation8_spill] sm:$0xff] }
 0x433   :  { %2774 = vmatpush1.bf16.msk.msra.mxu1 %vm3270_vm14, %v2772_v51  ;;  %v2089_v23 = vld [vmem:[#allocation2 + $0x78] sm:$0xf]  ;;  %v2088_v30 = vld [vmem:[#allocation2 + $0x70] sm:$0xf]  ;;  %v3901_v51 = vsub.s32 %v1101_v59, %v4052_v40 }
 0x434   :  { %v2779_v45 = vpack.c.bf16 %v2089_v23, %v2085_v33  ;;  %2785 = vmatprep.subr.bf16.mxu1 %v2909_v49  ;;  %v2782_v9 = vpack.c.bf16 %v2088_v30, %v2084_v63  ;;  %v4053_v23 = vcombine.low %v3382_v13, %v3387_v28  ;;  %v4056_v28 = vld [vmem:[#allocation19_spill] sm:$0xff] }
 0x436   :  { %2599 = vmatmul.mubr.msk.f32.vlgmr.msra.gmra.mrb[12].mxu1 %vm883_vm7, %v2072_v52  ;;  %2781 = vmatprep.subr.msk.bf16.mxu0 %vm3270_vm14, %v2779_v45  ;;  %v1112_v30 = vrot.slane %v4053_v23, %v3901_v51 }
 0x437   :  { %2784 = vmatpush1.bf16.msk.msra.mxu0 %vm3270_vm14, %v2782_v9  ;;  %2787 = vmatpush3.bf16.msra.mxu1 %v4051_v4  ;;  %v4054_v9 = vld [vmem:[#allocation21_spill] sm:$0xff] }
 0x438   :  { %2178 = vmatprep.mubr.f32.mxu1 %v4013_v37  ;;  %2788 = vmatprep.subr.bf16.mxu1 %v2909_v49  ;;  %v4055_v4 = vcombine.low %v3384_v8, %v4054_v9 }
 0x43a   :  { %2600 = vmatmul.mubr.msk.f32.gmra.mrb[14].mxu1 %vm883_vm7, %v2073_v17  ;;  %2603 = vmatmul.mubr.msk.f32.vlgmr.msra.gmra.mrb[32].mxu0 %vm883_vm7, %v2072_v52 }
 0x43b   :  { %2255 = vmatprep.mubr.f32.mxu0 %v4013_v37  ;;  %2713 = vmatprep.mubr.msk.f32.mxu1 %vm2910_vm5, %v4013_v37 }
 0x43e   :  { %2604 = vmatmul.mubr.msk.f32.gmra.mrb[34].mxu0 %vm883_vm7, %v2073_v17  ;;  %v1252_v17 = vrot.slane %v4055_v4, %v3901_v51 }
 0x4d9   :  { %v969_v56 = vpop.f32.mrb[2].mxu1 }
 0x4da   :  { %v1057_v31 = vmul.f32 %v969_v56, %v3038_v16  ;;  %v1197_v53 = vmul.f32 %v969_v56, %v4030_v19  ;;  %v971_v2 = vpop.f32.mrb[3].mxu1 }
 0x4db   :  { %v1058_v25 = vmul.f32 %v971_v2, %v3038_v16  ;;  %v1198_v49 = vmul.f32 %v971_v2, %v4030_v19 }
 0x4dd   :  { %v975_v6 = vpop.f32.mrb[4].mxu1 }
 0x4de   :  { %v1061_v0 = vmul.f32 %v3036_v15, %v975_v6  ;;  %v1201_v54 = vmul.f32 %v4029_v20, %v975_v6  ;;  %v977_v36 = vpop.f32.mrb[5].mxu1 }
 0x4df   :  { %v1062_v11 = vmul.f32 %v3036_v15, %v977_v36  ;;  %v1202_v29 = vmul.f32 %v4029_v20, %v977_v36 }
 0x4e0   :  { %v1065_v44 = vadd.f32 %v1061_v0, %v1057_v31  ;;  %v1205_v61 = vadd.f32 %v1201_v54, %v1197_v53  ;;  %v4057_v0 = vld [vmem:[#allocation20_spill] sm:$0xff] }
 0x4e1   :  { %v1072_v27 = vadd.f32 %v1062_v11, %v1058_v25  ;;  %v1212_v57 = vadd.f32 %v1202_v29, %v1198_v49  ;;  %v1192_v1 = vpop.f32.mrb[6].mxu1  ;;  %v4058_v54 = vpack.c.bf16 %v4056_v28, %v4057_v0 }
 0x4e2   :  { %v1066_v3 = vrot.slane %v1065_v44, 4  ;;  %v1206_v47 = vrot.slane %v1205_v61, 4  ;;  %v2678_v16 = vpop.f32.mrb[7].mxu1 }
 0x4e3   :  { %v1073_v26 = vrot.slane %v1072_v27, 4  ;;  %v1213_v19 = vrot.slane %v1212_v57, 4 }
 0x4e4   :  { %v1067_v12 = vadd.f32 %v1066_v3, %v1065_v44  ;;  %v1207_v21 = vadd.f32 %v1206_v47, %v1205_v61 }
 0x4e5   :  { %v1074_v39 = vadd.f32 %v1073_v26, %v1072_v27  ;;  %v1214_v58 = vadd.f32 %v1213_v19, %v1212_v57  ;;  %v1328_v22 = vpop.f32.mrb[8].mxu1 }
 0x4e6   :  { %v1068_v15 = vrot.slane %v1067_v12, 2  ;;  %v1208_v48 = vrot.slane %v1207_v21, 2  ;;  %v2685_v20 = vpop.f32.mrb[9].mxu1 }
 0x4e7   :  { %v1075_v46 = vrot.slane %v1074_v39, 2  ;;  %v1215_v34 = vrot.slane %v1214_v58, 2 }
 0x4e8   :  { %v1069_v50 = vadd.f32 %v1068_v15, %v1067_v12  ;;  %v1209_v62 = vadd.f32 %v1208_v48, %v1207_v21 }
 0x4e9   :  { %v1076_v60 = vadd.f32 %v1075_v46, %v1074_v39  ;;  %v1216_v35 = vadd.f32 %v1215_v34, %v1214_v58 }
 0x4ea   :  { %v1070_v5 = vrot.slane %v1069_v50, 1  ;;  %v1210_v38 = vrot.slane %v1209_v62, 1 }
 0x4eb   :  { %v1077_v18 = vrot.slane %v1076_v60, 1  ;;  %v1217_v41 = vrot.slane %v1216_v35, 1 }
 0x4ec   :  { %v1071_v55 = vadd.f32 %v1070_v5, %v1069_v50  ;;  %v1211_v14 = vadd.f32 %v1210_v38, %v1209_v62 }
 0x4ed   :  { %v1078_v42 = vadd.f32 %v1077_v18, %v1076_v60  ;;  %v1218_v24 = vadd.f32 %v1217_v41, %v1216_v35 }
 0x4ef   :  { %v1097_v33 = vcombine.low %v1071_v55, %v1078_v42  ;;  %v1237_v63 = vcombine.low %v1211_v14, %v1218_v24 }
 0x4f1   :  { %v1105_v52 = vrot.slane %v1097_v33, %v3901_v51  ;;  %v1245_v45 = vrot.slane %v1237_v63, %v3901_v51 }
 0x4f3   :  { %v1113_v56 = vcombine.low %v1105_v52, %v1112_v30  ;;  %v1253_v31 = vcombine.low %v1245_v45, %v1252_v17 }
 0x4f5   :  { %v1120_v53 = vrot.slane %v1113_v56, %v3901_v51  ;;  %v1260_v2 = vrot.slane %v1253_v31, %v3901_v51 }
 0x4f7   :  { %v1193_v25 = vadd.f32 %v1192_v1, %v1120_v53  ;;  %v1329_v49 = vadd.f32 %v1328_v22, %v1260_v2 }
 0x4f9   :  { %1196 = vst [vmem:[#allocation3] sm:$0xf] %v1193_v25  ;;  %1332 = vst [vmem:[#allocation3 + $0x4] sm:$0xf] %v1329_v49 }
 0x4fa   :  { %v1916_v6 = vpop.f32.mrb[10].mxu1 }
 0x4fb   :  { %2714 = vmatmul.mubr.msk.f32.vlgmr.msra.gmra.mrb[16].mxu1 %vm1122_vm8, %v1916_v6  ;;  %v1918_v13 = vpop.f32.mrb[11].mxu1 }
 0x4fc   :  { %2790 = vmatpush3.bf16.msra.mxu1 %v4058_v54  ;;  %2720 = vmatprep.mubr.msk.f32.mxu1 %vm2910_vm5, %v4013_v37 }
 0x4ff   :  { %2721 = vmatmul.mubr.msk.f32.vlgmr.msra.gmra.mrb[18].mxu1 %vm1122_vm8, %v1916_v6 }
 0x509   :  { %v2174_v8 = vpop.f32.mrb[12].mxu1 }
 0x50a   :  { %v2262_v36 = vmul.f32 %v2174_v8, %v3355_v43  ;;  %v2402_v11 = vmul.f32 %v2174_v8, %v4057_v0  ;;  %v2176_v29 = vpop.f32.mrb[13].mxu1 }
 0x50b   :  { %v2263_v44 = vmul.f32 %v2176_v29, %v3355_v43  ;;  %v2403_v61 = vmul.f32 %v2176_v29, %v4057_v0 }
 0x50d   :  { %v2180_v27 = vpop.f32.mrb[14].mxu1  ;;  %v2251_v57 = vpop.f32.mrb[32].mxu0 }
 0x50e   :  { %v2266_v1 = vmul.f32 %v3353_v10, %v2180_v27  ;;  %v2406_v3 = vmul.f32 %v4056_v28, %v2180_v27  ;;  %v2264_v37 = vmul.f32 %v2251_v57, %v3355_v43  ;;  %v2404_v47 = vmul.f32 %v2251_v57, %v4057_v0  ;;  %v2182_v16 = vpop.f32.mrb[15].mxu1  ;;  %v2253_v26 = vpop.f32.mrb[33].mxu0 }
 0x50f   :  { %v2267_v19 = vmul.f32 %v3353_v10, %v2182_v16  ;;  %v2407_v12 = vmul.f32 %v4056_v28, %v2182_v16  ;;  %v2265_v21 = vmul.f32 %v2253_v26, %v3355_v43  ;;  %v2405_v39 = vmul.f32 %v2253_v26, %v4057_v0 }
 0x510   :  { %v2270_v58 = vadd.f32 %v2266_v1, %v2262_v36  ;;  %v2410_v32 = vadd.f32 %v2406_v3, %v2402_v11 }
 0x511   :  { %v2277_v7 = vadd.f32 %v2267_v19, %v2263_v44  ;;  %v2417_v22 = vadd.f32 %v2407_v12, %v2403_v61  ;;  %v2257_v15 = vpop.f32.mrb[34].mxu0 }
 0x512   :  { %v2271_v48 = vrot.slane %v2270_v58, 4  ;;  %v2411_v20 = vrot.slane %v2410_v32, 4  ;;  %v2268_v46 = vmul.f32 %v3353_v10, %v2257_v15  ;;  %v2408_v34 = vmul.f32 %v4056_v28, %v2257_v15  ;;  %v2259_v50 = vpop.f32.mrb[35].mxu0 }
 0x513   :  { %v2278_v62 = vrot.slane %v2277_v7, 4  ;;  %v2418_v60 = vrot.slane %v2417_v22, 4  ;;  %v2269_v35 = vmul.f32 %v3353_v10, %v2259_v50  ;;  %v2409_v43 = vmul.f32 %v4056_v28, %v2259_v50 }
 0x514   :  { %v2272_v59 = vadd.f32 %v2271_v48, %v2270_v58  ;;  %v2412_v5 = vadd.f32 %v2411_v20, %v2410_v32  ;;  %v2284_v38 = vadd.f32 %v2268_v46, %v2264_v37  ;;  %v2424_v18 = vadd.f32 %v2408_v34, %v2404_v47 }
 0x515   :  { %v2279_v41 = vadd.f32 %v2278_v62, %v2277_v7  ;;  %v2419_v55 = vadd.f32 %v2418_v60, %v2417_v22  ;;  %v2291_v14 = vadd.f32 %v2269_v35, %v2265_v21  ;;  %v2431_v42 = vadd.f32 %v2409_v43, %v2405_v39 }
 0x516   :  { %v2273_v24 = vrot.slane %v2272_v59, 2  ;;  %v2413_v40 = vrot.slane %v2412_v5, 2  ;;  %v2285_v33 = vrot.slane %v2284_v38, 4  ;;  %v2425_v63 = vrot.slane %v2424_v18, 4 }
 0x517   :  { %v2280_v52 = vrot.slane %v2279_v41, 2  ;;  %v2420_v23 = vrot.slane %v2419_v55, 2  ;;  %v2292_v30 = vrot.slane %v2291_v14, 4  ;;  %v2432_v45 = vrot.slane %v2431_v42, 4 }
 0x518   :  { %v2274_v9 = vadd.f32 %v2273_v24, %v2272_v59  ;;  %v2414_v10 = vadd.f32 %v2413_v40, %v2412_v5  ;;  %v2286_v4 = vadd.f32 %v2285_v33, %v2284_v38  ;;  %v2426_v17 = vadd.f32 %v2425_v63, %v2424_v18 }
 0x519   :  { %v2281_v56 = vadd.f32 %v2280_v52, %v2279_v41  ;;  %v2421_v31 = vadd.f32 %v2420_v23, %v2419_v55  ;;  %v2293_v53 = vadd.f32 %v2292_v30, %v2291_v14  ;;  %v2433_v2 = vadd.f32 %v2432_v45, %v2431_v42 }
 0x51a   :  { %v2275_v25 = vrot.slane %v2274_v9, 1  ;;  %v2415_v49 = vrot.slane %v2414_v10, 1  ;;  %v2287_v6 = vrot.slane %v2286_v4, 2  ;;  %v2427_v13 = vrot.slane %v2426_v17, 2 }
 0x51b   :  { %v2282_v28 = vrot.slane %v2281_v56, 1  ;;  %v2422_v0 = vrot.slane %v2421_v31, 1  ;;  %v2294_v54 = vrot.slane %v2293_v53, 2  ;;  %v2434_v8 = vrot.slane %v2433_v2, 2 }
 0x51c   :  { %v2276_v36 = vadd.f32 %v2275_v25, %v2274_v9  ;;  %v2416_v11 = vadd.f32 %v2415_v49, %v2414_v10  ;;  %v2288_v29 = vadd.f32 %v2287_v6, %v2286_v4  ;;  %v2428_v44 = vadd.f32 %v2427_v13, %v2426_v17 }
 0x51d   :  { %v2283_v61 = vadd.f32 %v2282_v28, %v2281_v56  ;;  %v2423_v27 = vadd.f32 %v2422_v0, %v2421_v31  ;;  %v2295_v57 = vadd.f32 %v2294_v54, %v2293_v53  ;;  %v2435_v1 = vadd.f32 %v2434_v8, %v2433_v2 }
 0x51e   :  { %v2289_v3 = vrot.slane %v2288_v29, 1  ;;  %v2429_v37 = vrot.slane %v2428_v44, 1 }
 0x51f   :  { %v2296_v47 = vrot.slane %v2295_v57, 1  ;;  %v2436_v16 = vrot.slane %v2435_v1, 1  ;;  %v2302_v26 = vcombine.low %v2276_v36, %v2283_v61  ;;  %v2442_v19 = vcombine.low %v2416_v11, %v2423_v27 }
 0x520   :  { %v2290_v12 = vadd.f32 %v2289_v3, %v2288_v29  ;;  %v2430_v21 = vadd.f32 %v2429_v37, %v2428_v44 }
 0x521   :  { %v2297_v39 = vadd.f32 %v2296_v47, %v2295_v57  ;;  %v2437_v58 = vadd.f32 %v2436_v16, %v2435_v1  ;;  %v2310_v22 = vrot.slane %v2302_v26, %v3901_v51  ;;  %v2450_v48 = vrot.slane %v2442_v19, %v3901_v51 }
 0x523   :  { %v2303_v32 = vcombine.low %v2290_v12, %v2297_v39  ;;  %v2443_v7 = vcombine.low %v2430_v21, %v2437_v58 }
 0x525   :  { %v2317_v15 = vrot.slane %v2303_v32, %v3901_v51  ;;  %v2457_v20 = vrot.slane %v2443_v7, %v3901_v51 }
 0x527   :  { %v2318_v46 = vcombine.low %v2310_v22, %v2317_v15  ;;  %v2458_v34 = vcombine.low %v2450_v48, %v2457_v20 }
 0x529   :  { %v2325_v50 = vrot.slane %v2318_v46, %v3901_v51  ;;  %v2465_v43 = vrot.slane %v2458_v34, %v3901_v51 }
 0x5ce   :  { %v2396_v62 = vpop.f32.mrb[16].mxu1 }
 0x5cf   :  { %v2397_v60 = vadd.f32 %v2396_v62, %v2325_v50  ;;  %v2715_v35 = vpop.f32.mrb[17].mxu1 }
 0x5d1   :  { %2401 = vst [vmem:[#allocation3 + $0x8] sm:$0xf] %v2397_v60 }
 0x5d2   :  { %v2533_v59 = vpop.f32.mrb[18].mxu1 }
 0x5d3   :  { %v2534_v5 = vadd.f32 %v2533_v59, %v2465_v43  ;;  %v2722_v38 = vpop.f32.mrb[19].mxu1 }
 0x5d5   :  { %2537 = vst [vmem:[#allocation3 + $0xc] sm:$0xf] %v2534_v5 }
 0x5d6   :  { %2886 = shalt.err (!%p2883_p4)
}
 0x5d7   :  { %s2887_s6 = scalar_lea.hbm %s3959_s3, 256 }
 0x5d8   :  { %p2888_p5 = scmp.ne.s32.totalorder %s3959_s3, %s2887_s6  ;;  %p2891_p6 = scmp.lt.u32.totalorder %s2887_s6, %s3959_s3 }
 0x5da   :  { %p2893_p7 = pnand %p2891_p6, %p2888_p5 }
 0x5dc   :  { %2896 = shalt.err (!%p2893_p7)
}
 0x5dd   :  { %s2913_s11 = smov 128   ;;  %s2914_s12 = smov 8  }
 0x5de   :  { %2549 = dma.vmem_to_hbm [thread:$0]  %s2544_s29, 256, %s3959_s3, [#allocation4], %s2913_s11, %s2913_s11, %s2914_s12  }
 0x5df   :  { %2897 = dma.done.wait [#allocation4], 256  }
 0x5e0   :  { %2898 = vsyncadd [#allocation4], 4294967040 }
 0x5e1   :  { %2553 = vsyncpa [#allocation4], 1 }

</bundles_post_ra>
